<compile_context>
chip_gen: v7x
topology: tpu7x:2x2x1
jax: 0.10.0
libtpu: 0.0.40
codegen_flags: <defaults>
</compile_context>

<pallas_src>
import functools
import numpy as np
import jax
import jax.numpy as jnp
from jax.experimental import pallas as pl
from jax.experimental.pallas import tpu as pltpu


# ------------------------------ tiling helpers ------------------------------ #

def _round_up(x, m):
    return ((x + m - 1) // m) * m


def _pick_lane_tile(mpad, max_tile):
    # Largest power-of-two lane tile (>=128) that divides Mpad and leaves >= 2
    # grid steps, so v7x's two TensorCores both get work and the pipeline can
    # overlap prefetch/writeback.  Mpad is always a multiple of 128 and >=256,
    # so 128 always qualifies; the fallback is defensive only.
    t = max_tile
    while t >= 128:
        if mpad % t == 0 and mpad // t >= 2:
            return t
        t //= 2
    return mpad


# ----------------------------- Pallas kernels ------------------------------- #

def _fused_matmul_t_kernel(w_ref, a_ref, main_ref, sc_ref, sum_ref, sq_ref, *, c_out):
    # [2C, K]bf16 @ [K, TM]bf16 -> f32 [2C, TM].  Rows [:C] = 3x3x3 main conv,
    # rows [C:] = 1x1x1 downsample conv (centre-tap columns of W_aug^T).
    acc = jnp.dot(w_ref[...], a_ref[...], preferred_element_type=jnp.float32)
    main_ref[...] = acc[:c_out, :].astype(main_ref.dtype)   # lane-dense bf16 store
    sc_ref[...] = acc[c_out:, :].astype(sc_ref.dtype)
    # Per-tile BatchNorm partials (lane reduction).  Padded columns are exact
    # zeros (no bias), so they contribute nothing; wrapper divides by true M.
    sum_ref[...] = jnp.sum(acc, axis=-1, keepdims=True)[None]
    sq_ref[...] = jnp.sum(acc * acc, axis=-1, keepdims=True)[None]


def _matmul_t_stats_kernel(w_ref, a_ref, o_ref, sum_ref, sq_ref):
    acc = jnp.dot(w_ref[...], a_ref[...], preferred_element_type=jnp.float32)
    o_ref[...] = acc.astype(o_ref.dtype)
    sum_ref[...] = jnp.sum(acc, axis=-1, keepdims=True)[None]
    sq_ref[...] = jnp.sum(acc * acc, axis=-1, keepdims=True)[None]


def _bn_relu_kernel(x_ref, s_ref, t_ref, o_ref):
    # f32 elementwise math (v5e-safe); only the store is bf16 (feeds next MXU pass).
    x = x_ref[...].astype(jnp.float32)
    o_ref[...] = jnp.maximum(x * s_ref[...] + t_ref[...], 0.0).astype(o_ref.dtype)


def _bn_add_bn_relu_kernel(z_ref, sc_ref, s1_ref, t1_ref, s2_ref, t2_ref, o_ref):
    z = z_ref[...].astype(jnp.float32)
    sc = sc_ref[...].astype(jnp.float32)
    main = z * s1_ref[...] + t1_ref[...]          # bn1(conv1 output)
    shortcut = sc * s2_ref[...] + t2_ref[...]     # downsample BN
    o_ref[...] = jnp.maximum(main + shortcut, 0.0).astype(o_ref.dtype)


# --------------------------- pallas_call wrappers ---------------------------- #

def fused_conv_ds_matmul(w_aug_t, patches_t, c_out):
    n2, kp = w_aug_t.shape
    _, mpad = patches_t.shape
    tm = _pick_lane_tile(mpad, max_tile=4096)
    grid = mpad // tm
    kern = functools.partial(_fused_matmul_t_kernel, c_out=c_out)
    return pl.pallas_call(
        kern,
        out_shape=(jax.ShapeDtypeStruct((c_out, mpad), jnp.bfloat16),
                   jax.ShapeDtypeStruct((c_out, mpad), jnp.bfloat16),
                   jax.ShapeDtypeStruct((grid, n2, 1), jnp.float32),
                   jax.ShapeDtypeStruct((grid, n2, 1), jnp.float32)),
        grid=(grid,),
        in_specs=[pl.BlockSpec((n2, kp), lambda i: (0, 0)),
                  pl.BlockSpec((kp, tm), lambda i: (0, i))],
        out_specs=(pl.BlockSpec((c_out, tm), lambda i: (0, i)),
                   pl.BlockSpec((c_out, tm), lambda i: (0, i)),
                   pl.BlockSpec((1, n2, 1), lambda i: (i, 0, 0)),
                   pl.BlockSpec((1, n2, 1), lambda i: (i, 0, 0))),
        compiler_params=pltpu.CompilerParams(dimension_semantics=("parallel",)),
    )(w_aug_t, patches_t)


def conv_matmul(w_t, patches_t):
    n, kp = w_t.shape
    _, mpad = patches_t.shape
    tm = _pick_lane_tile(mpad, max_tile=4096)
    grid = mpad // tm
    return pl.pallas_call(
        _matmul_t_stats_kernel,
        out_shape=(jax.ShapeDtypeStruct((n, mpad), jnp.bfloat16),
                   jax.ShapeDtypeStruct((grid, n, 1), jnp.float32),
                   jax.ShapeDtypeStruct((grid, n, 1), jnp.float32)),
        grid=(grid,),
        in_specs=[pl.BlockSpec((n, kp), lambda i: (0, 0)),
                  pl.BlockSpec((kp, tm), lambda i: (0, i))],
        out_specs=(pl.BlockSpec((n, tm), lambda i: (0, i)),
                   pl.BlockSpec((1, n, 1), lambda i: (i, 0, 0)),
                   pl.BlockSpec((1, n, 1), lambda i: (i, 0, 0))),
        compiler_params=pltpu.CompilerParams(dimension_semantics=("parallel",)),
    )(w_t, patches_t)


def bn_relu_cm(x_cm, scale_col, shift_col, out_dtype):
    c, mpad = x_cm.shape
    tl = _pick_lane_tile(mpad, max_tile=16384)
    mat = pl.BlockSpec((c, tl), lambda i: (0, i))
    vec = pl.BlockSpec((c, 1), lambda i: (0, 0))
    return pl.pallas_call(
        _bn_relu_kernel,
        out_shape=jax.ShapeDtypeStruct((c, mpad), out_dtype),
        grid=(mpad // tl,),
        in_specs=[mat, vec, vec],
        out_specs=mat,
        compiler_params=pltpu.CompilerParams(dimension_semantics=("parallel",)),
    )(x_cm, scale_col, shift_col)


def bn_add_bn_relu_cm(z_cm, sc_cm, s1, t1, s2, t2):
    c, mpad = z_cm.shape
    tl = _pick_lane_tile(mpad, max_tile=16384)
    mat = pl.BlockSpec((c, tl), lambda i: (0, i))
    vec = pl.BlockSpec((c, 1), lambda i: (0, 0))
    return pl.pallas_call(
        _bn_add_bn_relu_kernel,
        out_shape=jax.ShapeDtypeStruct((c, mpad), jnp.float32),
        grid=(mpad // tl,),
        in_specs=[mat, mat, vec, vec, vec, vec],
        out_specs=mat,
        compiler_params=pltpu.CompilerParams(dimension_semantics=("parallel",)),
    )(z_cm, sc_cm, s1, t1, s2, t2)


# ------------------------------- glue (JAX) --------------------------------- #

def _im2col_3d_cm(x_cm, ksize, stride, pad):
    # x_cm: [C, N, D, H, W] -> patches^T [k^3*C, N*Do*Ho*Wo]; K order = (kd, kh, kw, c),
    # column order = (n, do, ho, wo).
    c, n, d, h, w = x_cm.shape
    xp = jnp.pad(x_cm, ((0, 0), (0, 0), (pad, pad), (pad, pad), (pad, pad)))
    do = (d + 2 * pad - ksize) // stride + 1
    ho = (h + 2 * pad - ksize) // stride + 1
    wo = (w + 2 * pad - ksize) // stride + 1
    cols = []
    for kd in range(ksize):
        for kh in range(ksize):
            for kw in range(ksize):
                cols.append(xp[:, :, kd:kd + (do - 1) * stride + 1:stride,
                                      kh:kh + (ho - 1) * stride + 1:stride,
                                      kw:kw + (wo - 1) * stride + 1:stride])
    patches_t = jnp.stack(cols, axis=0).reshape(ksize ** 3 * c, n * do * ho * wo)
    return patches_t, (n, do, ho, wo)


def _bn_scale_shift_from_partials(psum, psq, count, gamma, beta, eps=1e-5):
    # Finish training-mode BN statistics from tiny per-tile partials [grid, C].
    s = jnp.sum(psum, axis=0)
    q = jnp.sum(psq, axis=0)
    mean = s / count
    var = jnp.maximum(q / count - mean * mean, 0.0)   # biased (batch) variance
    scale = gamma * jax.lax.rsqrt(var + eps)
    shift = beta - mean * scale
    return scale, shift


def _col(v):
    # per-channel vector -> [C, 1] f32 column (broadcast along lanes in-kernel)
    return v[:, None].astype(jnp.float32)


def resbasicblock_forward(x_ncdhw, params, in_channel, channel, stride):
    if not (stride != 1 or in_channel != channel * 4):
        # TODO(synk): identity-shortcut branch not exercised (it would be
        # shape-inconsistent in the original module anyway).
        raise NotImplementedError("identity shortcut branch not implemented")

    c = channel
    cin = in_channel
    # channel-major activation [C, N, D, H, W], bf16 (halves im2col patch traffic)
    x_cm = jnp.transpose(x_ncdhw, (1, 0, 2, 3, 4)).astype(jnp.bfloat16)

    # -- launch 1: fused (3x3x3 main | 1x1x1 downsample) matmul + BN partials --
    patches1_t, (n, do, ho, wo) = _im2col_3d_cm(x_cm, 3, stride, 1)   # [27*Cin, M]
    k1 = patches1_t.shape[0]
    m = n * do * ho * wo
    mpad = max(_round_up(m, 128), 256)          # >= 2 lane tiles of 128
    k1p = _round_up(k1, 16)                     # bf16 sublane quantum
    patches1_t = jnp.pad(patches1_t, ((0, k1p - k1), (0, mpad - m)))

    w_main = jnp.transpose(params["conv_w"], (2, 3, 4, 1, 0)).reshape(k1, c)  # [K1, C]
    ds_mat = params["ds_w"].reshape(c, cin)                                   # [C, Cin]
    ctr = 13 * cin                                                            # centre tap (kd=kh=kw=1)
    w_aug_t = jnp.zeros((2 * c, k1p), jnp.float32)
    w_aug_t = w_aug_t.at[:c, :k1].set(w_main.T)
    w_aug_t = w_aug_t.at[c:, ctr:ctr + cin].set(ds_mat)
    # conv bias intentionally dropped: training-mode BN's mean subtraction cancels it.
    main_cm, sc_cm, p1_sum, p1_sq = fused_conv_ds_matmul(
        w_aug_t.astype(jnp.bfloat16), patches1_t, c)

    s_bn, t_bn = _bn_scale_shift_from_partials(
        p1_sum[:, :c, 0], p1_sq[:, :c, 0], m, params["bn_gamma"], params["bn_beta"])
    s_ds, t_ds = _bn_scale_shift_from_partials(
        p1_sum[:, c:, 0], p1_sq[:, c:, 0], m, params["ds_gamma"], params["ds_beta"])

    # -- launch 2: BN + ReLU on the main path, channel-major lane-dense --
    y_cm = bn_relu_cm(main_cm, _col(s_bn), _col(t_bn), jnp.bfloat16)   # [C, mpad] bf16

    # padded columns of y are max(shift, 0) != 0, so slice before re-im2col
    y = y_cm[:, :m].reshape(c, n, do, ho, wo)

    # -- launch 3: conv1 (3x3x3, stride 1) matmul + BN partials --
    patches2_t, _ = _im2col_3d_cm(y, 3, 1, 1)                          # [27*C, M]
    k2 = patches2_t.shape[0]
    m2 = patches2_t.shape[1]
    assert m2 == m  # stride-1, pad-1, k=3 conv preserves spatial dims
    k2p = _round_up(k2, 16)
    patches2_t = jnp.pad(patches2_t, ((0, k2p - k2), (0, mpad - m2)))
    w1_t = jnp.zeros((c, k2p), jnp.float32)
    w1_t = w1_t.at[:, :k2].set(
        jnp.transpose(params["conv1_w"], (2, 3, 4, 1, 0)).reshape(k2, c).T)
    z_cm, p2_sum, p2_sq = conv_matmul(w1_t.astype(jnp.bfloat16), patches2_t)
    s_bn1, t_bn1 = _bn_scale_shift_from_partials(
        p2_sum[:, :, 0], p2_sq[:, :, 0], m2, params["bn1_gamma"], params["bn1_beta"])

    # -- launch 4: bn1(z) + bn_ds(shortcut) + add + ReLU, channel-major lane-dense --
    out_cm = bn_add_bn_relu_cm(z_cm, sc_cm,
                               _col(s_bn1), _col(t_bn1), _col(s_ds), _col(t_ds))
    out = out_cm[:, :m].reshape(c, n, do, ho, wo)
    return jnp.transpose(out, (1, 0, 2, 3, 4))                          # back to NCDHW


# ------------------------ pure-JAX f32 reference (check) --------------------- #

def _conv3d_ref(x_ndhwc, w, b, stride, pad):
    out = jax.lax.conv_general_dilated(
        x_ndhwc, jnp.transpose(w, (2, 3, 4, 1, 0)),
        window_strides=(stride,) * 3, padding=[(pad, pad)] * 3,
        dimension_numbers=("NDHWC", "DHWIO", "NDHWC"),
        precision=jax.lax.Precision.HIGHEST)
    if b is not None:
        out = out + b
    return out


def _bn_ref(x, gamma, beta, eps=1e-5):
    mean = jnp.mean(x, axis=(0, 1, 2, 3))
    var = jnp.mean((x - mean) ** 2, axis=(0, 1, 2, 3))
    return (x - mean) / jnp.sqrt(var + eps) * gamma + beta


def resbasicblock_ref(x_ncdhw, params, stride):
    x = jnp.transpose(x_ncdhw, (0, 2, 3, 4, 1))
    sc = _bn_ref(_conv3d_ref(x, params["ds_w"], None, stride, 0),
                 params["ds_gamma"], params["ds_beta"])
    y = jnp.maximum(_bn_ref(_conv3d_ref(x, params["conv_w"], params["conv_b"], stride, 1),
                            params["bn_gamma"], params["bn_beta"]), 0.0)
    z = _bn_ref(_conv3d_ref(y, params["conv1_w"], params["conv1_b"], 1, 1),
                params["bn1_gamma"], params["bn1_beta"])
    return jnp.transpose(jnp.maximum(z + sc, 0.0), (0, 4, 1, 2, 3))


# ---------------------------------- main ------------------------------------ #

if __name__ == "__main__":
    in_channel, channel = 4, 8            # downsample path active (4 != 8*4)
    n, d, h, w = 2, 8, 8, 8

    keys = jax.random.split(jax.random.PRNGKey(0), 12)
    params = {
        "conv_w":    0.05 * jax.random.normal(keys[0], (channel, in_channel, 3, 3, 3), jnp.float32),
        "conv_b":    0.05 * jax.random.normal(keys[1], (channel,), jnp.float32),   # cancelled by BN
        "conv1_w":   0.05 * jax.random.normal(keys[2], (channel, channel, 3, 3, 3), jnp.float32),
        "conv1_b":   0.05 * jax.random.normal(keys[3], (channel,), jnp.float32),   # cancelled by BN
        "ds_w":      0.05 * jax.random.normal(keys[4], (channel, in_channel, 1, 1, 1), jnp.float32),
        "bn_gamma":  1.0 + 0.1 * jax.random.normal(keys[5], (channel,), jnp.float32),
        "bn_beta":   0.1 * jax.random.normal(keys[6], (channel,), jnp.float32),
        "bn1_gamma": 1.0 + 0.1 * jax.random.normal(keys[7], (channel,), jnp.float32),
        "bn1_beta":  0.1 * jax.random.normal(keys[8], (channel,), jnp.float32),
        "ds_gamma":  1.0 + 0.1 * jax.random.normal(keys[9], (channel,), jnp.float32),
        "ds_beta":   0.1 * jax.random.normal(keys[10], (channel,), jnp.float32),
    }
    x = jax.random.normal(keys[11], (n, in_channel, d, h, w), jnp.float32)

    fwd = jax.jit(resbasicblock_forward, static_argnums=(2, 3, 4))

    for stride in (1, 2):   # stride=2 also exercises conv+downsample fusion alignment
        out = jax.block_until_ready(fwd(x, params, in_channel, channel, stride))
        ref = jax.block_until_ready(resbasicblock_ref(x, params, stride))
        assert out.shape == ref.shape, (out.shape, ref.shape)
        out_np = np.asarray(out, np.float32)
        ref_np = np.asarray(ref, np.float32)
        max_abs = float(np.max(np.abs(out_np - ref_np)))
        rel_l2 = float(np.linalg.norm(out_np - ref_np) / (np.linalg.norm(ref_np) + 1e-12))
        # bf16 MXU inputs + bf16 intermediate storage (f32 accumulation / BN math)
        # vs pure-f32 reference -> looser tolerance.
        if not (max_abs < 2e-1 and rel_l2 < 5e-2):
            raise AssertionError(
                f"stride={stride}: mismatch (max_abs={max_abs:.3e}, rel_l2={rel_l2:.3e})")

    print("KERNEL_OK")
</pallas_src>

<mosaic_0001>
module attributes {stable_mosaic.version = 11 : i64} {
  func.func @_fused_matmul_t_kernel(%arg0: i32, %arg1: memref<16x112xbf16, #tpu.memory_space<vmem>>, %arg2: memref<112x512xbf16, #tpu.memory_space<vmem>>, %arg3: memref<8x512xbf16, #tpu.memory_space<vmem>>, %arg4: memref<8x512xbf16, #tpu.memory_space<vmem>>, %arg5: memref<1x16x1xf32, #tpu.memory_space<vmem>>, %arg6: memref<1x16x1xf32, #tpu.memory_space<vmem>>) attributes {dimension_semantics = [#tpu.dimension_semantics<parallel>], iteration_bounds = array<i64: 2>, scalar_prefetch = 0 : i64, scratch_operands = 0 : i64, tpu.core_type = #tpu.core_type<tc>, window_params = [{pipeline_mode = #tpu.pipeline_mode<synchronous>, transform_indices = @transform_0, window_bounds = array<i64: 16, 112>}, {transform_indices = @transform_1, window_bounds = array<i64: 112, 512>}, {transform_indices = @transform_2, window_bounds = array<i64: 8, 512>}, {transform_indices = @transform_3, window_bounds = array<i64: 8, 512>}, {transform_indices = @transform_4, window_bounds = array<i64: 1, 16, 1>}, {transform_indices = @transform_5, window_bounds = array<i64: 1, 16, 1>}]} {
    %c0 = arith.constant 0 : index
    %c0_0 = arith.constant 0 : index
    %0 = vector.load %arg1[%c0, %c0_0] : memref<16x112xbf16, #tpu.memory_space<vmem>>, vector<16x112xbf16>
    %c0_1 = arith.constant 0 : index
    %c0_2 = arith.constant 0 : index
    %1 = vector.load %arg2[%c0_1, %c0_2] : memref<112x512xbf16, #tpu.memory_space<vmem>>, vector<112x512xbf16>
    %cst = arith.constant dense<0.000000e+00> : vector<16x512xf32>
    %2 = tpu.matmul %0, %1, %cst {dimension_numbers = #tpu.dot_dimension_numbers<[1], [0], [0], [1], [0, 0, 1, 1], [], []>} : vector<16x112xbf16>, vector<112x512xbf16>, vector<16x512xf32> -> vector<16x512xf32>
    %3 = vector.extract_strided_slice %2 {offsets = [0, 0], sizes = [8, 512], strides = [1, 1]} : vector<16x512xf32> to vector<8x512xf32>
    %4 = arith.truncf %3 : vector<8x512xf32> to vector<8x512xbf16>
    %c0_3 = arith.constant 0 : index
    %c0_4 = arith.constant 0 : index
    %5 = vector.load %arg3[%c0_3, %c0_4] : memref<8x512xbf16, #tpu.memory_space<vmem>>, vector<8x512xbf16>
    tpu.vector_store %arg3[%c0_3, %c0_4], %4 {strides = array<i32>} : memref<8x512xbf16, #tpu.memory_space<vmem>>, vector<8x512xbf16>,
    %6 = vector.extract_strided_slice %2 {offsets = [8, 0], sizes = [8, 512], strides = [1, 1]} : vector<16x512xf32> to vector<8x512xf32>
    %7 = arith.truncf %6 : vector<8x512xf32> to vector<8x512xbf16>
    %c0_5 = arith.constant 0 : index
    %c0_6 = arith.constant 0 : index
    %8 = vector.load %arg4[%c0_5, %c0_6] : memref<8x512xbf16, #tpu.memory_space<vmem>>, vector<8x512xbf16>
    tpu.vector_store %arg4[%c0_5, %c0_6], %7 {strides = array<i32>} : memref<8x512xbf16, #tpu.memory_space<vmem>>, vector<8x512xbf16>,
    %cst_7 = arith.constant dense<0.000000e+00> : vector<16xf32>
    %9 = vector.multi_reduction <add>, %2, %cst_7 [1] : vector<16x512xf32> to vector<16xf32>
    %10 = vector.shape_cast %9 : vector<16xf32> to vector<16x1xf32>
    %11 = vector.shape_cast %10 : vector<16x1xf32> to vector<1x16x1xf32>
    %c0_8 = arith.constant 0 : index
    %c0_9 = arith.constant 0 : index
    %c0_10 = arith.constant 0 : index
    %12 = vector.load %arg5[%c0_8, %c0_9, %c0_10] : memref<1x16x1xf32, #tpu.memory_space<vmem>>, vector<1x16x1xf32>
    tpu.vector_store %arg5[%c0_8, %c0_9, %c0_10], %11 {strides = array<i32>} : memref<1x16x1xf32, #tpu.memory_space<vmem>>, vector<1x16x1xf32>,
    %13 = arith.mulf %2, %2 : vector<16x512xf32>
    %cst_11 = arith.constant dense<0.000000e+00> : vector<16xf32>
    %14 = vector.multi_reduction <add>, %13, %cst_11 [1] : vector<16x512xf32> to vector<16xf32>
    %15 = vector.shape_cast %14 : vector<16xf32> to vector<16x1xf32>
    %16 = vector.shape_cast %15 : vector<16x1xf32> to vector<1x16x1xf32>
    %c0_12 = arith.constant 0 : index
    %c0_13 = arith.constant 0 : index
    %c0_14 = arith.constant 0 : index
    %17 = vector.load %arg6[%c0_12, %c0_13, %c0_14] : memref<1x16x1xf32, #tpu.memory_space<vmem>>, vector<1x16x1xf32>
    tpu.vector_store %arg6[%c0_12, %c0_13, %c0_14], %16 {strides = array<i32>} : memref<1x16x1xf32, #tpu.memory_space<vmem>>, vector<1x16x1xf32>,
    return
  }
  func.func @transform_0(%arg0: i32) -> (i32, i32) {
    %c0_i32 = arith.constant 0 : i32
    %c0_i32_0 = arith.constant 0 : i32
    %c0_i32_1 = arith.constant 0 : i32
    return %c0_i32, %c0_i32_0 : i32, i32
  }
  func.func @transform_1(%arg0: i32) -> (i32, i32) {
    %c0_i32 = arith.constant 0 : i32
    %c0_i32_0 = arith.constant 0 : i32
    return %c0_i32, %arg0 : i32, i32
  }
  func.func @transform_2(%arg0: i32) -> (i32, i32) {
    %c0_i32 = arith.constant 0 : i32
    %c0_i32_0 = arith.constant 0 : i32
    return %c0_i32, %arg0 : i32, i32
  }
  func.func @transform_3(%arg0: i32) -> (i32, i32) {
    %c0_i32 = arith.constant 0 : i32
    %c0_i32_0 = arith.constant 0 : i32
    return %c0_i32, %arg0 : i32, i32
  }
  func.func @transform_4(%arg0: i32) -> (i32, i32, i32) {
    %c0_i32 = arith.constant 0 : i32
    %c0_i32_0 = arith.constant 0 : i32
    %c0_i32_1 = arith.constant 0 : i32
    return %arg0, %c0_i32, %c0_i32_0 : i32, i32, i32
  }
  func.func @transform_5(%arg0: i32) -> (i32, i32, i32) {
    %c0_i32 = arith.constant 0 : i32
    %c0_i32_0 = arith.constant 0 : i32
    %c0_i32_1 = arith.constant 0 : i32
    return %arg0, %c0_i32, %c0_i32_0 : i32, i32, i32
  }
}

module attributes {stable_mosaic.version = 11 : i64} {
  func.func @_bn_relu_kernel(%arg0: i32, %arg1: memref<8x512xbf16, #tpu.memory_space<vmem>>, %arg2: memref<8x1xf32, #tpu.memory_space<vmem>>, %arg3: memref<8x1xf32, #tpu.memory_space<vmem>>, %arg4: memref<8x512xbf16, #tpu.memory_space<vmem>>) attributes {dimension_semantics = [#tpu.dimension_semantics<parallel>], iteration_bounds = array<i64: 2>, scalar_prefetch = 0 : i64, scratch_operands = 0 : i64, tpu.core_type = #tpu.core_type<tc>, window_params = [{transform_indices = @transform_0, window_bounds = array<i64: 8, 512>}, {pipeline_mode = #tpu.pipeline_mode<synchronous>, transform_indices = @transform_1, window_bounds = array<i64: 8, 1>}, {pipeline_mode = #tpu.pipeline_mode<synchronous>, transform_indices = @transform_2, window_bounds = array<i64: 8, 1>}, {transform_indices = @transform_3, window_bounds = array<i64: 8, 512>}]} {
    %c0 = arith.constant 0 : index
    %c0_0 = arith.constant 0 : index
    %0 = vector.load %arg1[%c0, %c0_0] : memref<8x512xbf16, #tpu.memory_space<vmem>>, vector<8x512xbf16>
    %1 = arith.extf %0 : vector<8x512xbf16> to vector<8x512xf32>
    %c0_1 = arith.constant 0 : index
    %c0_2 = arith.constant 0 : index
    %2 = vector.load %arg2[%c0_1, %c0_2] : memref<8x1xf32, #tpu.memory_space<vmem>>, vector<8x1xf32>
    %3 = vector.broadcast %2 : vector<8x1xf32> to vector<8x512xf32>
    %4 = arith.mulf %1, %3 : vector<8x512xf32>
    %c0_3 = arith.constant 0 : index
    %c0_4 = arith.constant 0 : index
    %5 = vector.load %arg3[%c0_3, %c0_4] : memref<8x1xf32, #tpu.memory_space<vmem>>, vector<8x1xf32>
    %6 = vector.broadcast %5 : vector<8x1xf32> to vector<8x512xf32>
    %7 = arith.addf %4, %6 : vector<8x512xf32>
    %cst = arith.constant 0.000000e+00 : f32
    %8 = vector.broadcast %cst : f32 to vector<8x512xf32>
    %9 = arith.maximumf %7, %8 : vector<8x512xf32>
    %10 = arith.truncf %9 : vector<8x512xf32> to vector<8x512xbf16>
    %c0_5 = arith.constant 0 : index
    %c0_6 = arith.constant 0 : index
    %11 = vector.load %arg4[%c0_5, %c0_6] : memref<8x512xbf16, #tpu.memory_space<vmem>>, vector<8x512xbf16>
    tpu.vector_store %arg4[%c0_5, %c0_6], %10 {strides = array<i32>} : memref<8x512xbf16, #tpu.memory_space<vmem>>, vector<8x512xbf16>,
    return
  }
  func.func @transform_0(%arg0: i32) -> (i32, i32) {
    %c0_i32 = arith.constant 0 : i32
    %c0_i32_0 = arith.constant 0 : i32
    return %c0_i32, %arg0 : i32, i32
  }
  func.func @transform_1(%arg0: i32) -> (i32, i32) {
    %c0_i32 = arith.constant 0 : i32
    %c0_i32_0 = arith.constant 0 : i32
    %c0_i32_1 = arith.constant 0 : i32
    return %c0_i32, %c0_i32_0 : i32, i32
  }
  func.func @transform_2(%arg0: i32) -> (i32, i32) {
    %c0_i32 = arith.constant 0 : i32
    %c0_i32_0 = arith.constant 0 : i32
    %c0_i32_1 = arith.constant 0 : i32
    return %c0_i32, %c0_i32_0 : i32, i32
  }
  func.func @transform_3(%arg0: i32) -> (i32, i32) {
    %c0_i32 = arith.constant 0 : i32
    %c0_i32_0 = arith.constant 0 : i32
    return %c0_i32, %arg0 : i32, i32
  }
}

module attributes {stable_mosaic.version = 11 : i64} {
  func.func @_matmul_t_stats_kernel(%arg0: i32, %arg1: memref<8x224xbf16, #tpu.memory_space<vmem>>, %arg2: memref<224x512xbf16, #tpu.memory_space<vmem>>, %arg3: memref<8x512xbf16, #tpu.memory_space<vmem>>, %arg4: memref<1x8x1xf32, #tpu.memory_space<vmem>>, %arg5: memref<1x8x1xf32, #tpu.memory_space<vmem>>) attributes {dimension_semantics = [#tpu.dimension_semantics<parallel>], iteration_bounds = array<i64: 2>, scalar_prefetch = 0 : i64, scratch_operands = 0 : i64, tpu.core_type = #tpu.core_type<tc>, window_params = [{pipeline_mode = #tpu.pipeline_mode<synchronous>, transform_indices = @transform_0, window_bounds = array<i64: 8, 224>}, {transform_indices = @transform_1, window_bounds = array<i64: 224, 512>}, {transform_indices = @transform_2, window_bounds = array<i64: 8, 512>}, {transform_indices = @transform_3, window_bounds = array<i64: 1, 8, 1>}, {transform_indices = @transform_4, window_bounds = array<i64: 1, 8, 1>}]} {
    %c0 = arith.constant 0 : index
    %c0_0 = arith.constant 0 : index
    %0 = vector.load %arg1[%c0, %c0_0] : memref<8x224xbf16, #tpu.memory_space<vmem>>, vector<8x224xbf16>
    %c0_1 = arith.constant 0 : index
    %c0_2 = arith.constant 0 : index
    %1 = vector.load %arg2[%c0_1, %c0_2] : memref<224x512xbf16, #tpu.memory_space<vmem>>, vector<224x512xbf16>
    %cst = arith.constant dense<0.000000e+00> : vector<8x512xf32>
    %2 = tpu.matmul %0, %1, %cst {dimension_numbers = #tpu.dot_dimension_numbers<[1], [0], [0], [1], [0, 0, 1, 1], [], []>} : vector<8x224xbf16>, vector<224x512xbf16>, vector<8x512xf32> -> vector<8x512xf32>
    %3 = arith.truncf %2 : vector<8x512xf32> to vector<8x512xbf16>
    %c0_3 = arith.constant 0 : index
    %c0_4 = arith.constant 0 : index
    %4 = vector.load %arg3[%c0_3, %c0_4] : memref<8x512xbf16, #tpu.memory_space<vmem>>, vector<8x512xbf16>
    tpu.vector_store %arg3[%c0_3, %c0_4], %3 {strides = array<i32>} : memref<8x512xbf16, #tpu.memory_space<vmem>>, vector<8x512xbf16>,
    %cst_5 = arith.constant dense<0.000000e+00> : vector<8xf32>
    %5 = vector.multi_reduction <add>, %2, %cst_5 [1] : vector<8x512xf32> to vector<8xf32>
    %6 = vector.shape_cast %5 : vector<8xf32> to vector<8x1xf32>
    %7 = vector.shape_cast %6 : vector<8x1xf32> to vector<1x8x1xf32>
    %c0_6 = arith.constant 0 : index
    %c0_7 = arith.constant 0 : index
    %c0_8 = arith.constant 0 : index
    %8 = vector.load %arg4[%c0_6, %c0_7, %c0_8] : memref<1x8x1xf32, #tpu.memory_space<vmem>>, vector<1x8x1xf32>
    tpu.vector_store %arg4[%c0_6, %c0_7, %c0_8], %7 {strides = array<i32>} : memref<1x8x1xf32, #tpu.memory_space<vmem>>, vector<1x8x1xf32>,
    %9 = arith.mulf %2, %2 : vector<8x512xf32>
    %cst_9 = arith.constant dense<0.000000e+00> : vector<8xf32>
    %10 = vector.multi_reduction <add>, %9, %cst_9 [1] : vector<8x512xf32> to vector<8xf32>
    %11 = vector.shape_cast %10 : vector<8xf32> to vector<8x1xf32>
    %12 = vector.shape_cast %11 : vector<8x1xf32> to vector<1x8x1xf32>
    %c0_10 = arith.constant 0 : index
    %c0_11 = arith.constant 0 : index
    %c0_12 = arith.constant 0 : index
    %13 = vector.load %arg5[%c0_10, %c0_11, %c0_12] : memref<1x8x1xf32, #tpu.memory_space<vmem>>, vector<1x8x1xf32>
    tpu.vector_store %arg5[%c0_10, %c0_11, %c0_12], %12 {strides = array<i32>} : memref<1x8x1xf32, #tpu.memory_space<vmem>>, vector<1x8x1xf32>,
    return
  }
  func.func @transform_0(%arg0: i32) -> (i32, i32) {
    %c0_i32 = arith.constant 0 : i32
    %c0_i32_0 = arith.constant 0 : i32
    %c0_i32_1 = arith.constant 0 : i32
    return %c0_i32, %c0_i32_0 : i32, i32
  }
  func.func @transform_1(%arg0: i32) -> (i32, i32) {
    %c0_i32 = arith.constant 0 : i32
    %c0_i32_0 = arith.constant 0 : i32
    return %c0_i32, %arg0 : i32, i32
  }
  func.func @transform_2(%arg0: i32) -> (i32, i32) {
    %c0_i32 = arith.constant 0 : i32
    %c0_i32_0 = arith.constant 0 : i32
    return %c0_i32, %arg0 : i32, i32
  }
  func.func @transform_3(%arg0: i32) -> (i32, i32, i32) {
    %c0_i32 = arith.constant 0 : i32
    %c0_i32_0 = arith.constant 0 : i32
    %c0_i32_1 = arith.constant 0 : i32
    return %arg0, %c0_i32, %c0_i32_0 : i32, i32, i32
  }
  func.func @transform_4(%arg0: i32) -> (i32, i32, i32) {
    %c0_i32 = arith.constant 0 : i32
    %c0_i32_0 = arith.constant 0 : i32
    %c0_i32_1 = arith.constant 0 : i32
    return %arg0, %c0_i32, %c0_i32_0 : i32, i32, i32
  }
}

module attributes {stable_mosaic.version = 11 : i64} {
  func.func @_bn_add_bn_relu_kernel(%arg0: i32, %arg1: memref<8x512xbf16, #tpu.memory_space<vmem>>, %arg2: memref<8x512xbf16, #tpu.memory_space<vmem>>, %arg3: memref<8x1xf32, #tpu.memory_space<vmem>>, %arg4: memref<8x1xf32, #tpu.memory_space<vmem>>, %arg5: memref<8x1xf32, #tpu.memory_space<vmem>>, %arg6: memref<8x1xf32, #tpu.memory_space<vmem>>, %arg7: memref<8x512xf32, #tpu.memory_space<vmem>>) attributes {dimension_semantics = [#tpu.dimension_semantics<parallel>], iteration_bounds = array<i64: 2>, scalar_prefetch = 0 : i64, scratch_operands = 0 : i64, tpu.core_type = #tpu.core_type<tc>, window_params = [{transform_indices = @transform_0, window_bounds = array<i64: 8, 512>}, {transform_indices = @transform_1, window_bounds = array<i64: 8, 512>}, {pipeline_mode = #tpu.pipeline_mode<synchronous>, transform_indices = @transform_2, window_bounds = array<i64: 8, 1>}, {pipeline_mode = #tpu.pipeline_mode<synchronous>, transform_indices = @transform_3, window_bounds = array<i64: 8, 1>}, {pipeline_mode = #tpu.pipeline_mode<synchronous>, transform_indices = @transform_4, window_bounds = array<i64: 8, 1>}, {pipeline_mode = #tpu.pipeline_mode<synchronous>, transform_indices = @transform_5, window_bounds = array<i64: 8, 1>}, {transform_indices = @transform_6, window_bounds = array<i64: 8, 512>}]} {
    %c0 = arith.constant 0 : index
    %c0_0 = arith.constant 0 : index
    %0 = vector.load %arg1[%c0, %c0_0] : memref<8x512xbf16, #tpu.memory_space<vmem>>, vector<8x512xbf16>
    %1 = arith.extf %0 : vector<8x512xbf16> to vector<8x512xf32>
    %c0_1 = arith.constant 0 : index
    %c0_2 = arith.constant 0 : index
    %2 = vector.load %arg2[%c0_1, %c0_2] : memref<8x512xbf16, #tpu.memory_space<vmem>>, vector<8x512xbf16>
    %3 = arith.extf %2 : vector<8x512xbf16> to vector<8x512xf32>
    %c0_3 = arith.constant 0 : index
    %c0_4 = arith.constant 0 : index
    %4 = vector.load %arg3[%c0_3, %c0_4] : memref<8x1xf32, #tpu.memory_space<vmem>>, vector<8x1xf32>
    %5 = vector.broadcast %4 : vector<8x1xf32> to vector<8x512xf32>
    %6 = arith.mulf %1, %5 : vector<8x512xf32>
    %c0_5 = arith.constant 0 : index
    %c0_6 = arith.constant 0 : index
    %7 = vector.load %arg4[%c0_5, %c0_6] : memref<8x1xf32, #tpu.memory_space<vmem>>, vector<8x1xf32>
    %8 = vector.broadcast %7 : vector<8x1xf32> to vector<8x512xf32>
    %9 = arith.addf %6, %8 : vector<8x512xf32>
    %c0_7 = arith.constant 0 : index
    %c0_8 = arith.constant 0 : index
    %10 = vector.load %arg5[%c0_7, %c0_8] : memref<8x1xf32, #tpu.memory_space<vmem>>, vector<8x1xf32>
    %11 = vector.broadcast %10 : vector<8x1xf32> to vector<8x512xf32>
    %12 = arith.mulf %3, %11 : vector<8x512xf32>
    %c0_9 = arith.constant 0 : index
    %c0_10 = arith.constant 0 : index
    %13 = vector.load %arg6[%c0_9, %c0_10] : memref<8x1xf32, #tpu.memory_space<vmem>>, vector<8x1xf32>
    %14 = vector.broadcast %13 : vector<8x1xf32> to vector<8x512xf32>
    %15 = arith.addf %12, %14 : vector<8x512xf32>
    %16 = arith.addf %9, %15 : vector<8x512xf32>
    %cst = arith.constant 0.000000e+00 : f32
    %17 = vector.broadcast %cst : f32 to vector<8x512xf32>
    %18 = arith.maximumf %16, %17 : vector<8x512xf32>
    %c0_11 = arith.constant 0 : index
    %c0_12 = arith.constant 0 : index
    %19 = vector.load %arg7[%c0_11, %c0_12] : memref<8x512xf32, #tpu.memory_space<vmem>>, vector<8x512xf32>
    tpu.vector_store %arg7[%c0_11, %c0_12], %18 {strides = array<i32>} : memref<8x512xf32, #tpu.memory_space<vmem>>, vector<8x512xf32>,
    return
  }
  func.func @transform_0(%arg0: i32) -> (i32, i32) {
    %c0_i32 = arith.constant 0 : i32
    %c0_i32_0 = arith.constant 0 : i32
    return %c0_i32, %arg0 : i32, i32
  }
  func.func @transform_1(%arg0: i32) -> (i32, i32) {
    %c0_i32 = arith.constant 0 : i32
    %c0_i32_0 = arith.constant 0 : i32
    return %c0_i32, %arg0 : i32, i32
  }
  func.func @transform_2(%arg0: i32) -> (i32, i32) {
    %c0_i32 = arith.constant 0 : i32
    %c0_i32_0 = arith.constant 0 : i32
    %c0_i32_1 = arith.constant 0 : i32
    return %c0_i32, %c0_i32_0 : i32, i32
  }
  func.func @transform_3(%arg0: i32) -> (i32, i32) {
    %c0_i32 = arith.constant 0 : i32
    %c0_i32_0 = arith.constant 0 : i32
    %c0_i32_1 = arith.constant 0 : i32
    return %c0_i32, %c0_i32_0 : i32, i32
  }
  func.func @transform_4(%arg0: i32) -> (i32, i32) {
    %c0_i32 = arith.constant 0 : i32
    %c0_i32_0 = arith.constant 0 : i32
    %c0_i32_1 = arith.constant 0 : i32
    return %c0_i32, %c0_i32_0 : i32, i32
  }
  func.func @transform_5(%arg0: i32) -> (i32, i32) {
    %c0_i32 = arith.constant 0 : i32
    %c0_i32_0 = arith.constant 0 : i32
    %c0_i32_1 = arith.constant 0 : i32
    return %c0_i32, %c0_i32_0 : i32, i32
  }
  func.func @transform_6(%arg0: i32) -> (i32, i32) {
    %c0_i32 = arith.constant 0 : i32
    %c0_i32_0 = arith.constant 0 : i32
    return %c0_i32, %arg0 : i32, i32
  }
}

</mosaic_0001>

<bundles_post_ra>
// kernel: resbasicblock_forward.5
= control target key start
LH: loop header
LB: loop body
LE: loop exit
PB: predicated region body
PF: predicated region fallthrough
CT: control target
= control target key end

     0   :  { %s332_s12 = smov 0   ;;  %s355_s0 = inlined_call_operand.vmem [shape: bf16[8,1024], index: 0, kind: input, shape index: {}]   ;;  %s356_s1 = inlined_call_operand.vmem [shape: f32[8,1], index: 1, kind: input, shape index: {}]   ;;  %s357_s2 = inlined_call_operand.vmem [shape: f32[8,1], index: 2, kind: input, shape index: {}]   ;;  %s358_s3 = inlined_call_operand.vmem [shape: bf16[8,1024], index: 3, kind: output, shape index: {}]  }
   0x1 LB: > { %s278_s13 = sadd.s32 4294967295, %s309_s12   ;;  %p282_p0 = scmp.ge.s32.totalorder %s309_s12, 1  ;;  %s309_s12 = sphi %s332_s12, %s13_s12  }
   0x2   : > { %p138_p1 = scmp.lt.s32.totalorder %s309_s12, 3 }
   0x4   : > { %p139_p2 = pnand %p282_p0, %p138_p1 }
   0x5   : > { %v180_v0 = vld [vmem:[%s356_s1] sm:$0xff] (!%p139_p2)  ;;  %v311_v1 = vmov (!%p139_p2), 0   ;;  %s283_s18 = sshll.u32 (!%p139_p2), %s278_s13, 2 }
   0x6   : > { %142 = sbr.rel (%p139_p2) target bundleno = 146 (0x92), region = 32  ;;  %302 = vset.pattern.permute.xlu0 (!%p139_p2), %v311_v1  ;;  %v190_v2 = vld [vmem:[%s357_s2] sm:$0xff] (!%p139_p2)  ;;  %p163_p3 = scmp.lt.s32.totalorder (!%p139_p2), %s283_s18, 7 }
   0x7   : > { %183 = vperm.xlu0 (!%p139_p2), %302, %v180_v0  }
   0xb   : > { %193 = vperm.xlu0 (!%p139_p2), %302, %v190_v2  }
   0xd   : > { %s360_s18 = smov (!%p163_p3, %s283_s18), 7 }
   0xe   : > { %s284_s19 = sshll.u32 %s360_s18, 2 }
   0xf   : > { %s166_s22 = scalar_lea.vmem %s355_s0, %s284_s19  ;;  %s172_s25 = scalar_lea.vmem %s358_s3, %s284_s19 }
  0x10   : > { %v174_v3 = vld [vmem:[%s166_s22] sm:$0xff]  ;;  %v175_v4 = vld [vmem:[%s166_s22 + $0x8] sm:$0xff] }
  0x11   : > { %v176_v5 = vunpack.c.l.bf16 %v174_v3  ;;  %v177_v6 = vunpack.c.h.bf16 %v174_v3  ;;  %v178_v7 = vunpack.c.l.bf16 %v175_v4  ;;  %v179_v8 = vunpack.c.h.bf16 %v175_v4 }
  0x86   : > { %v184_v9 = vpop.permute.xlu0 %183 }
  0x87   : > { %v186_v10 = vmul.f32 %v184_v9, %v176_v5  ;;  %v187_v11 = vmul.f32 %v184_v9, %v177_v6  ;;  %v188_v12 = vmul.f32 %v184_v9, %v178_v7  ;;  %v189_v13 = vmul.f32 %v184_v9, %v179_v8 }
  0x8a   : > { %v194_v14 = vpop.permute.xlu0 %193 }
  0x8b   : > { %v196_v15 = vadd.f32 %v194_v14, %v186_v10  ;;  %v197_v16 = vadd.f32 %v194_v14, %v187_v11  ;;  %v198_v17 = vadd.f32 %v194_v14, %v188_v12  ;;  %v199_v18 = vadd.f32 %v194_v14, %v189_v13 }
  0x8d   : > { %v200_v19 = vmax.f32 %v196_v15, 0.0  ;;  %v201_v20 = vmax.f32 %v197_v16, 0.0  ;;  %v202_v21 = vmax.f32 %v198_v17, 0.0  ;;  %v203_v22 = vmax.f32 %v199_v18, 0.0 }
  0x8f   : > { %v291_v23 = vpack.c.bf16 %v201_v20, %v200_v19  ;;  %v292_v24 = vpack.c.bf16 %v203_v22, %v202_v21 }
  0x91   : > { %220 = vst [vmem:[%s172_s25] sm:$0xff] %v291_v23  ;;  %221 = vst [vmem:[%s172_s25 + $0x8] sm:$0xff] %v292_v24 }
  0x92 PF: > { %s13_s12 = sadd.s32 1, %s309_s12  }
  0x93   : > { %p10_p4 = scmp.ge.s32.totalorder %s13_s12, 4  }
  0x95   :  { %12 = sbr.rel (!%p10_p4) target bundleno = 1 (0x1), region = 62 }

// kernel: resbasicblock_forward.4
= control target key start
LH: loop header
LB: loop body
LE: loop exit
PB: predicated region body
PF: predicated region fallthrough
CT: control target
= control target key end

     0   :  { %s1020_s18 = smov 0   ;;  %s1022_s19 = smov 0   ;;  %s1177_s0 = inlined_call_operand.vmem [shape: bf16[16,112], index: 0, kind: input, shape index: {}]   ;;  %s1178_s1 = inlined_call_operand.vmem [shape: bf16[112,1024], index: 1, kind: input, shape index: {}]   ;;  %s1179_s2 = inlined_call_operand.vmem [shape: bf16[8,1024], index: 2, kind: output, shape index: {0}]   ;;  %s1180_s3 = inlined_call_operand.vmem [shape: bf16[8,1024], index: 3, kind: output, shape index: {1}]   ;;  %s1181_s4 = inlined_call_operand.vmem [shape: f32[2,16,1], index: 4, kind: output, shape index: {2}]   ;;  %s1182_s5 = inlined_call_operand.vmem [shape: f32[2,16,1], index: 5, kind: output, shape index: {3}]  }
   0x1   :  { %s1024_s20 = smov 0  }
   0x2 LB: > { %s1036_s21 = sadd.s32 4294967295, %s987_s20   ;;  %s1039_s22 = sadd.s32 1, %s987_s20   ;;  %s987_s20 = sphi %s1024_s20, %s1185_s20   ;;  %s983_s19 = sphi %s1022_s19, %s1184_s19   ;;  %s979_s18 = sphi %s1020_s18, %s1183_s18  }
   0x3   : > { %s41_s23 = ssub.s32 %s987_s20, %s1039_s22  ;;  %s44_s24 = sadd.s32 1, %s983_s19 }
   0x4   : > { %p42_p0 = scmp.eq.s32.totalorder %s41_s23, 0  ;;  %p51_p1 = scmp.ne.s32.totalorder %s983_s19, %s979_s18 }
   0x5   : > { %p52_p2 = scmp.eq.s32.totalorder %s987_s20, 0  ;;  %p839_p4 = scmp.ge.s32.totalorder %s987_s20, 2 }
   0x6   : > { %s1048_s25 = scalar_select %p42_p0, %s983_s19, %s44_s24  }
   0x7   : > { %p53_p3 = por %p52_p2, %p51_p1  ;;  %184 = sbr.rel (%p839_p4) target bundleno = 32 (0x20), region = 20 }
   0xe   : > { %187 = sbr.rel (!%p53_p3) target bundleno = 32 (0x20), region = 24  ;;  %s189_s26 = sand.u32 (%p53_p3), 1, %s983_s19  }
   0xf   : > { %s888_s27 = sshll.u32 (%p53_p3), %s987_s20, 4  ;;  %s895_s28 = smul.u32 (%p53_p3), 224, %s189_s26 }
  0x10   : > { %s1056_s6 = scalar_lea.vmem (%p53_p3), %s1178_s1, %s888_s27 }
  0x11   : > { %v207_v0 = vld [vmem:[%s1056_s6] sm:$0xff] (%p53_p3)  ;;  %v209_v1 = vld [vmem:[%s1056_s6 + $0x8] sm:$0xff] (%p53_p3)  ;;  %s1064_s7 = scalar_lea.vmem (%p53_p3), [#allocation2], %s895_s28 }
  0x12   : > { %v211_v2 = vld [vmem:[%s1056_s6 + $0x20] sm:$0xff] (%p53_p3)  ;;  %v213_v3 = vld [vmem:[%s1056_s6 + $0x28] sm:$0xff] (%p53_p3)  ;;  %208 = vst [vmem:[%s1064_s7] sm:$0xff] (%p53_p3), %v207_v0  ;;  %210 = vst [vmem:[%s1064_s7 + $0x8] sm:$0xff] (%p53_p3), %v209_v1 }
  0x13   : > { %v215_v4 = vld [vmem:[%s1056_s6 + $0x40] sm:$0xff] (%p53_p3)  ;;  %v217_v5 = vld [vmem:[%s1056_s6 + $0x48] sm:$0xff] (%p53_p3)  ;;  %212 = vst [vmem:[%s1064_s7 + $0x10] sm:$0xff] (%p53_p3), %v211_v2  ;;  %214 = vst [vmem:[%s1064_s7 + $0x18] sm:$0xff] (%p53_p3), %v213_v3 }
  0x14   : > { %216 = vst [vmem:[%s1064_s7 + $0x20] sm:$0xff] (%p53_p3), %v215_v4  ;;  %218 = vst [vmem:[%s1064_s7 + $0x28] sm:$0xff] (%p53_p3), %v217_v5  ;;  %v219_v6 = vld [vmem:[%s1056_s6 + $0x60] sm:$0xff] (%p53_p3)  ;;  %v221_v7 = vld [vmem:[%s1056_s6 + $0x68] sm:$0xff] (%p53_p3) }
  0x15   : > { %v223_v8 = vld [vmem:[%s1056_s6 + $0x80] sm:$0xff]  ;;  %220 = vst [vmem:[%s1064_s7 + $0x30] sm:$0xff] %v219_v6  ;;  %222 = vst [vmem:[%s1064_s7 + $0x38] sm:$0xff] %v221_v7  ;;  %v225_v9 = vld [vmem:[%s1056_s6 + $0x88] sm:$0xff] }
  0x16   : > { %224 = vst [vmem:[%s1064_s7 + $0x40] sm:$0xff] %v223_v8  ;;  %v227_v10 = vld [vmem:[%s1056_s6 + $0xa0] sm:$0xff]  ;;  %v229_v11 = vld [vmem:[%s1056_s6 + $0xa8] sm:$0xff]  ;;  %226 = vst [vmem:[%s1064_s7 + $0x48] sm:$0xff] %v225_v9 }
  0x17   : > { %228 = vst [vmem:[%s1064_s7 + $0x50] sm:$0xff] %v227_v10  ;;  %230 = vst [vmem:[%s1064_s7 + $0x58] sm:$0xff] %v229_v11  ;;  %v231_v12 = vld [vmem:[%s1056_s6 + $0xc0] sm:$0xff]  ;;  %v233_v13 = vld [vmem:[%s1056_s6 + $0xc8] sm:$0xff] }
  0x18   : > { %v235_v14 = vld [vmem:[%s1056_s6 + $0xe0] sm:$0xff]  ;;  %232 = vst [vmem:[%s1064_s7 + $0x60] sm:$0xff] %v231_v12  ;;  %234 = vst [vmem:[%s1064_s7 + $0x68] sm:$0xff] %v233_v13  ;;  %v237_v15 = vld [vmem:[%s1056_s6 + $0xe8] sm:$0xff] }
  0x19   : > { %236 = vst [vmem:[%s1064_s7 + $0x70] sm:$0xff] %v235_v14  ;;  %v239_v16 = vld [vmem:[%s1056_s6 + $0x100] sm:$0xff]  ;;  %v241_v17 = vld [vmem:[%s1056_s6 + $0x108] sm:$0xff]  ;;  %238 = vst [vmem:[%s1064_s7 + $0x78] sm:$0xff] %v237_v15 }
  0x1a   : > { %240 = vst [vmem:[%s1064_s7 + $0x80] sm:$0xff] %v239_v16  ;;  %242 = vst [vmem:[%s1064_s7 + $0x88] sm:$0xff] %v241_v17  ;;  %v243_v18 = vld [vmem:[%s1056_s6 + $0x120] sm:$0xff]  ;;  %v245_v19 = vld [vmem:[%s1056_s6 + $0x128] sm:$0xff] }
  0x1b   : > { %v247_v20 = vld [vmem:[%s1056_s6 + $0x140] sm:$0xff]  ;;  %244 = vst [vmem:[%s1064_s7 + $0x90] sm:$0xff] %v243_v18  ;;  %246 = vst [vmem:[%s1064_s7 + $0x98] sm:$0xff] %v245_v19  ;;  %v249_v21 = vld [vmem:[%s1056_s6 + $0x148] sm:$0xff] }
  0x1c   : > { %248 = vst [vmem:[%s1064_s7 + $0xa0] sm:$0xff] %v247_v20  ;;  %v251_v22 = vld [vmem:[%s1056_s6 + $0x160] sm:$0xff]  ;;  %v253_v23 = vld [vmem:[%s1056_s6 + $0x168] sm:$0xff]  ;;  %250 = vst [vmem:[%s1064_s7 + $0xa8] sm:$0xff] %v249_v21 }
  0x1d   : > { %252 = vst [vmem:[%s1064_s7 + $0xb0] sm:$0xff] %v251_v22  ;;  %254 = vst [vmem:[%s1064_s7 + $0xb8] sm:$0xff] %v253_v23  ;;  %v255_v24 = vld [vmem:[%s1056_s6 + $0x180] sm:$0xff]  ;;  %v257_v25 = vld [vmem:[%s1056_s6 + $0x188] sm:$0xff] }
  0x1e   : > { %v259_v26 = vld [vmem:[%s1056_s6 + $0x1a0] sm:$0xff]  ;;  %256 = vst [vmem:[%s1064_s7 + $0xc0] sm:$0xff] %v255_v24  ;;  %258 = vst [vmem:[%s1064_s7 + $0xc8] sm:$0xff] %v257_v25  ;;  %v261_v27 = vld [vmem:[%s1056_s6 + $0x1a8] sm:$0xff] }
  0x1f   : > { %260 = vst [vmem:[%s1064_s7 + $0xd0] sm:$0xff] %v259_v26  ;;  %262 = vst [vmem:[%s1064_s7 + $0xd8] sm:$0xff] %v261_v27 }
  0x20 PF: > { %p842_p5 = scmp.ge.s32.totalorder %s987_s20, 1  ;;  %p267_p6 = scmp.lt.s32.totalorder %s987_s20, 3 }
  0x22   : > { %p268_p7 = pnand %p842_p5, %p267_p6 }
  0x23   : > { %s274_s8 = sand.u32 (!%p268_p7), 1, %s979_s18   ;;  %v989_v28 = vmov (!%p268_p7), 0   ;;  %v964_v57 = vld [vmem:[%s1177_s0] sm:$0xff] (!%p268_p7)   ;;  %vm515_vm0 = vcmask (!%p268_p7), 916480   ;;  %s843_s13 = sshll.u32 (!%p268_p7), %s1036_s21, 2  ;;  %vm651_vm1 = vcmask (!%p268_p7), 7168  }
  0x24   : > { %271 = sbr.rel (%p268_p7) target bundleno = 438 (0x1b6), region = 47  ;;  %551 = vmatprep.mubr.bf16.mxu0 (!%p268_p7), %v989_v28  ;;  %594 = vmatprep.mubr.bf16.mxu1 (!%p268_p7), %v989_v28  ;;  %p318_p8 = scmp.lt.s32.totalorder (!%p268_p7), %s843_s13, 7 }
  0x25   : > { %s896_s9 = smul.u32 (!%p268_p7), 224, %s274_s8  ;;  %p329_p9 = scmp.lt.s32.totalorder (!%p268_p7), %s1036_s21, 1 }
  0x27   : > { %s1119_s10 = scalar_lea.vmem (!%p268_p7), [#allocation2], %s896_s9 }
  0x28   : > { %v922_v29 = vld [vmem:[%s1119_s10 + $0x4] ss:$16 sps:$4 sm:$0xff] (!%p268_p7)   ;;  %v924_v30 = vld [vmem:[%s1119_s10 + $0xc] ss:$16 sps:$4 sm:$0xff] (!%p268_p7)   ;;  %v926_v31 = vld [vmem:[%s1119_s10] ss:$16 sps:$4 sm:$0xff] (!%p268_p7)  }
  0x29   : > { %519 = vmatprep.subr.bf16.mxu0 (!%p268_p7), %v922_v29  ;;  %v927_v32 = vld [vmem:[%s1119_s10 + $0x8] ss:$16 sps:$4 sm:$0xff] (!%p268_p7)   ;;  %562 = vmatprep.subr.bf16.mxu1 (!%p268_p7), %v924_v30  ;;  %v928_v33 = vld [vmem:[%s1119_s10 + $0x24] ss:$16 sps:$4 sm:$0xff] (!%p268_p7)   ;;  %v930_v34 = vld [vmem:[%s1119_s10 + $0x2c] ss:$16 sps:$4 sm:$0xff] (!%p268_p7)  }
  0x2a   : > { %520 = vmatpush1.bf16.msra.mxu0 (!%p268_p7), %v926_v31  ;;  %563 = vmatpush1.bf16.msra.mxu1 (!%p268_p7), %v927_v32  ;;  %v932_v35 = vld [vmem:[%s1119_s10 + $0x20] ss:$16 sps:$4 sm:$0xff] (!%p268_p7)   ;;  %v933_v36 = vld [vmem:[%s1119_s10 + $0x28] ss:$16 sps:$4 sm:$0xff] (!%p268_p7)   ;;  %v934_v37 = vld [vmem:[%s1119_s10 + $0x44] ss:$16 sps:$4 sm:$0xff] (!%p268_p7)  }
  0x2b   : > { %521 = vmatprep.subr.bf16.mxu0 %v928_v33  ;;  %564 = vmatprep.subr.bf16.mxu1 %v930_v34  ;;  %v936_v38 = vld [vmem:[%s1119_s10 + $0x4c] ss:$16 sps:$4 sm:$0xff]   ;;  %v938_v39 = vld [vmem:[%s1119_s10 + $0x40] ss:$16 sps:$4 sm:$0xff]   ;;  %v939_v40 = vld [vmem:[%s1119_s10 + $0x48] ss:$16 sps:$4 sm:$0xff]  }
  0x2c   : > { %v940_v41 = vld [vmem:[%s1119_s10 + $0x64] ss:$16 sps:$4 sm:$0xff]   ;;  %v942_v42 = vld [vmem:[%s1119_s10 + $0x6c] ss:$16 sps:$4 sm:$0xff]   ;;  %v944_v43 = vld [vmem:[%s1119_s10 + $0x60] ss:$16 sps:$4 sm:$0xff]  }
  0x2d   : > { %v945_v44 = vld [vmem:[%s1119_s10 + $0x68] ss:$16 sps:$4 sm:$0xff]   ;;  %v946_v45 = vld [vmem:[%s1119_s10 + $0x84] ss:$16 sps:$4 sm:$0xff]   ;;  %v948_v46 = vld [vmem:[%s1119_s10 + $0x8c] ss:$16 sps:$4 sm:$0xff]  }
  0x2e   : > { %522 = vmatpush1.bf16.msra.mxu0 %v932_v35  ;;  %565 = vmatpush1.bf16.msra.mxu1 %v933_v36  ;;  %v950_v47 = vld [vmem:[%s1119_s10 + $0x80] ss:$16 sps:$4 sm:$0xff]   ;;  %v951_v48 = vld [vmem:[%s1119_s10 + $0x88] ss:$16 sps:$4 sm:$0xff]   ;;  %v952_v49 = vld [vmem:[%s1119_s10 + $0xa4] ss:$16 sps:$4 sm:$0xff]  }
  0x2f   : > { %523 = vmatprep.subr.bf16.mxu0 %v934_v37  ;;  %566 = vmatprep.subr.bf16.mxu1 %v936_v38  ;;  %v954_v50 = vld [vmem:[%s1119_s10 + $0xac] ss:$16 sps:$4 sm:$0xff]   ;;  %v956_v51 = vld [vmem:[%s1119_s10 + $0xa0] ss:$16 sps:$4 sm:$0xff]   ;;  %v957_v52 = vld [vmem:[%s1119_s10 + $0xa8] ss:$16 sps:$4 sm:$0xff]  }
  0x30   : > { %v958_v53 = vld [vmem:[%s1119_s10 + $0xc4] ss:$16 sps:$4 sm:$0xff]   ;;  %v960_v54 = vld [vmem:[%s1119_s10 + $0xcc] ss:$16 sps:$4 sm:$0xff]   ;;  %v962_v55 = vld [vmem:[%s1119_s10 + $0xc0] ss:$16 sps:$4 sm:$0xff]  }
  0x31   : > { %v963_v56 = vld [vmem:[%s1119_s10 + $0xc8] ss:$16 sps:$4 sm:$0xff]   ;;  %s1187_s13 = smov (!%p318_p8, %s843_s13), 7  ;;  %s1189_s21 = smov (!%p329_p9, %s1036_s21), 1 }
  0x32   : > { %524 = vmatpush1.bf16.msra.mxu0 %v938_v39  ;;  %567 = vmatpush1.bf16.msra.mxu1 %v939_v40  ;;  %s844_s14 = sshll.u32 %s1187_s13, 2  ;;  %s889_s24 = sshll.u32 %s1189_s21, 4 }
  0x33   : > { %525 = vmatprep.subr.bf16.mxu0 %v940_v41  ;;  %568 = vmatprep.subr.bf16.mxu1 %v942_v42  ;;  %s321_s17 = scalar_lea.vmem %s1179_s2, %s844_s14  ;;  %s327_s23 = scalar_lea.vmem %s1180_s3, %s844_s14 }
  0x34   : > { %s333_s28 = scalar_lea.vmem %s1181_s4, %s889_s24  ;;  %s338_s6 = scalar_lea.vmem %s1182_s5, %s889_s24 }
  0x36   : > { %526 = vmatpush1.bf16.msra.mxu0 %v944_v43  ;;  %569 = vmatpush1.bf16.msra.mxu1 %v945_v44 }
  0x37   : > { %527 = vmatprep.subr.bf16.mxu0 %v946_v45  ;;  %570 = vmatprep.subr.bf16.mxu1 %v948_v46 }
  0x3a   : > { %528 = vmatpush1.bf16.msra.mxu0 %v950_v47  ;;  %571 = vmatpush1.bf16.msra.mxu1 %v951_v48 }
  0x3b   : > { %529 = vmatprep.subr.bf16.mxu0 %v952_v49  ;;  %572 = vmatprep.subr.bf16.mxu1 %v954_v50 }
  0x3e   : > { %530 = vmatpush1.bf16.msra.mxu0 %v956_v51  ;;  %573 = vmatpush1.bf16.msra.mxu1 %v957_v52 }
  0x3f   : > { %531 = vmatprep.subr.bf16.mxu0 %v958_v53  ;;  %574 = vmatprep.subr.bf16.mxu1 %v960_v54 }
  0x42   : > { %532 = vmatpush1.bf16.msra.mxu0 %v962_v55  ;;  %575 = vmatpush1.bf16.msra.mxu1 %v963_v56 }
  0x45   : > { %880 = vmatmul.mubr.msk.bf16.vlgmr.msra.gmra.mrb[0].mxu0 %vm515_vm0, %v964_v57  ;;  %881 = vmatmul.mubr.msk.bf16.vlgmr.msra.gmra.mrb[0].mxu1 %vm515_vm0, %v964_v57 }
 0x118   : > { %v553_v58 = vpop.f32.mrb[0].mxu0  ;;  %v596_v59 = vpop.f32.mrb[0].mxu1 }
 0x119   : > { %v654_v60 = vmul.f32 %v553_v58, %v553_v58  ;;  %v555_v61 = vpop.f32.mrb[1].mxu0  ;;  %v598_v62 = vpop.f32.mrb[1].mxu1  ;;  %v656_v5 = vmul.f32 %v596_v59, %v596_v59 }
 0x11a   : > { %v891_v63 = vpack.c.bf16 %v555_v61, %v553_v58  ;;  %v641_v0 = vadd.f32 %v555_v61, %v553_v58  ;;  %v655_v1 = vmul.f32 %v555_v61, %v555_v61  ;;  %v892_v2 = vpack.c.bf16 %v598_v62, %v596_v59  ;;  %v557_v3 = vpop.f32.mrb[2].mxu0  ;;  %v600_v4 = vpop.f32.mrb[2].mxu1 }
 0x11b   : > { %v658_v6 = vmul.f32 %v557_v3, %v557_v3  ;;  %v559_v7 = vpop.f32.mrb[3].mxu0  ;;  %v602_v8 = vpop.f32.mrb[3].mxu1  ;;  %v660_v15 = vmul.f32 %v600_v4, %v600_v4  ;;  %v657_v19 = vmul.f32 %v598_v62, %v598_v62 }
 0x11c   : > { %621 = vst [vmem:[%s321_s17] sm:$0xff] %v891_v63  ;;  %v893_v9 = vpack.c.bf16 %v559_v7, %v557_v3  ;;  %v646_v10 = vadd.f32 %v559_v7, %v557_v3  ;;  %v659_v11 = vmul.f32 %v559_v7, %v559_v7  ;;  %v894_v12 = vpack.c.bf16 %v602_v8, %v600_v4 }
 0x11d   : > { %622 = vst [vmem:[%s321_s17 + $0x8] sm:$0xff] %v892_v2  ;;  %v642_v13 = vadd.f32 %v641_v0, %v596_v59  ;;  %v662_v14 = vadd.f32 %v655_v1, %v654_v60  ;;  %v661_v21 = vmul.f32 %v602_v8, %v602_v8 }
 0x11e   : > { %639 = vst [vmem:[%s327_s23] sm:$0xff] %v893_v9  ;;  %v667_v16 = vadd.f32 %v659_v11, %v658_v6  ;;  %v647_v17 = vadd.f32 %v646_v10, %v600_v4  ;;  %640 = vst [vmem:[%s327_s23 + $0x8] sm:$0xff] %v894_v12 }
 0x11f   : > { %v643_v18 = vadd.f32 %v642_v13, %v598_v62  ;;  %v663_v20 = vadd.f32 %v662_v14, %v656_v5 }
 0x120   : > { %v648_v22 = vadd.f32 %v647_v17, %v602_v8  ;;  %v668_v23 = vadd.f32 %v667_v16, %v660_v15 }
 0x121   : > { %644 = vadd.xlane.f32.xlu0 %v643_v18  ;;  %v664_v24 = vadd.f32 %v663_v20, %v657_v19 }
 0x122   : > { %v669_v25 = vadd.f32 %v668_v23, %v661_v21 }
 0x123   : > { %665 = vadd.xlane.f32.xlu1 %v664_v24 }
 0x125   : > { %649 = vadd.xlane.f32.xlu0 %v648_v22 }
 0x127   : > { %670 = vadd.xlane.f32.xlu1 %v669_v25 }
 0x1ae   : > { %v645_v26 = vpop.xlane.xlu0 %644 }
 0x1af   : > { %652 = vst.msk [vmem:[%s333_s28] sm:$0xff] %vm651_vm1, %v645_v26 }
 0x1b0   : > { %v666_v27 = vpop.xlane.xlu1 %665 }
 0x1b1   : > { %672 = vst.msk [vmem:[%s338_s6] sm:$0xff] %vm651_vm1, %v666_v27 }
 0x1b2   : > { %v650_v28 = vpop.xlane.xlu0 %649 }
 0x1b3   : > { %653 = vst.msk [vmem:[%s333_s28 + $0x8] sm:$0xff] %vm651_vm1, %v650_v28 }
 0x1b4   : > { %v671_v29 = vpop.xlane.xlu1 %670 }
 0x1b5   : > { %673 = vst.msk [vmem:[%s338_s6 + $0x8] sm:$0xff] %vm651_vm1, %v671_v29 }
 0x1b6 PF: > { %p13_p10 = scmp.ge.s32.totalorder %s1039_s22, 4   ;;  %s1183_s18 = smov %s983_s19 }
 0x1b7   : > { %s1184_s19 = smov %s1048_s25  ;;  %s1185_s20 = smov %s1039_s22 }
 0x1b8   :  { %15 = sbr.rel (!%p13_p10) target bundleno = 2 (0x2), region = 122 }

// kernel: resbasicblock_forward.6
= control target key start
LH: loop header
LB: loop body
LE: loop exit
PB: predicated region body
PF: predicated region fallthrough
CT: control target
= control target key end

     0   :  { %s1179_s15 = smov 0   ;;  %s1181_s16 = smov 0   ;;  %s1423_s0 = inlined_call_operand.vmem [shape: bf16[8,224], index: 0, kind: input, shape index: {}]   ;;  %s1424_s1 = inlined_call_operand.vmem [shape: bf16[224,1024], index: 1, kind: input, shape index: {}]   ;;  %s1425_s2 = inlined_call_operand.vmem [shape: bf16[8,1024], index: 2, kind: output, shape index: {0}]   ;;  %s1426_s3 = inlined_call_operand.vmem [shape: f32[2,8,1], index: 3, kind: output, shape index: {1}]   ;;  %s1427_s4 = inlined_call_operand.vmem [shape: f32[2,8,1], index: 4, kind: output, shape index: {2}]  }
   0x1   :  { %s1183_s17 = smov 0  }
   0x2 LB: > { %s1195_s18 = sadd.s32 4294967295, %s1152_s17   ;;  %s1198_s19 = sadd.s32 1, %s1152_s17   ;;  %s1152_s17 = sphi %s1183_s17, %s1430_s17   ;;  %s1148_s16 = sphi %s1181_s16, %s1429_s16   ;;  %s1144_s15 = sphi %s1179_s15, %s1428_s15  }
   0x3   : > { %s40_s20 = ssub.s32 %s1152_s17, %s1198_s19  ;;  %s43_s21 = sadd.s32 1, %s1148_s16 }
   0x4   : > { %p41_p0 = scmp.eq.s32.totalorder %s40_s20, 0  ;;  %p50_p1 = scmp.ne.s32.totalorder %s1148_s16, %s1144_s15 }
   0x5   : > { %p51_p2 = scmp.eq.s32.totalorder %s1152_s17, 0  ;;  %p943_p4 = scmp.ge.s32.totalorder %s1152_s17, 2 }
   0x6   : > { %s1207_s22 = scalar_select %p41_p0, %s1148_s16, %s43_s21  }
   0x7   : > { %p52_p3 = por %p51_p2, %p50_p1  ;;  %157 = sbr.rel (%p943_p4) target bundleno = 46 (0x2e), region = 20 }
   0xe   : > { %160 = sbr.rel (!%p52_p3) target bundleno = 46 (0x2e), region = 24  ;;  %s162_s23 = sand.u32 (%p52_p3), 1, %s1148_s16  }
   0xf   : > { %s1015_s24 = sshll.u32 (%p52_p3), %s1152_s17, 4  ;;  %s1018_s25 = smul.u32 (%p52_p3), 448, %s162_s23 }
  0x10   : > { %s1215_s28 = scalar_lea.vmem (%p52_p3), %s1424_s1, %s1015_s24 }
  0x11   : > { %v180_v0 = vld [vmem:[%s1215_s28] sm:$0xff] (%p52_p3)  ;;  %v182_v1 = vld [vmem:[%s1215_s28 + $0x8] sm:$0xff] (%p52_p3)  ;;  %s1223_s29 = scalar_lea.vmem (%p52_p3), [#allocation2], %s1018_s25 }
  0x12   : > { %v184_v2 = vld [vmem:[%s1215_s28 + $0x20] sm:$0xff] (%p52_p3)  ;;  %v186_v3 = vld [vmem:[%s1215_s28 + $0x28] sm:$0xff] (%p52_p3)  ;;  %181 = vst [vmem:[%s1223_s29] sm:$0xff] (%p52_p3), %v180_v0  ;;  %183 = vst [vmem:[%s1223_s29 + $0x8] sm:$0xff] (%p52_p3), %v182_v1 }
  0x13   : > { %v188_v4 = vld [vmem:[%s1215_s28 + $0x40] sm:$0xff] (%p52_p3)  ;;  %v190_v5 = vld [vmem:[%s1215_s28 + $0x48] sm:$0xff] (%p52_p3)  ;;  %185 = vst [vmem:[%s1223_s29 + $0x10] sm:$0xff] (%p52_p3), %v184_v2  ;;  %187 = vst [vmem:[%s1223_s29 + $0x18] sm:$0xff] (%p52_p3), %v186_v3 }
  0x14   : > { %189 = vst [vmem:[%s1223_s29 + $0x20] sm:$0xff] (%p52_p3), %v188_v4  ;;  %191 = vst [vmem:[%s1223_s29 + $0x28] sm:$0xff] (%p52_p3), %v190_v5  ;;  %v192_v6 = vld [vmem:[%s1215_s28 + $0x60] sm:$0xff] (%p52_p3)  ;;  %v194_v7 = vld [vmem:[%s1215_s28 + $0x68] sm:$0xff] (%p52_p3) }
  0x15   : > { %v196_v8 = vld [vmem:[%s1215_s28 + $0x80] sm:$0xff]  ;;  %193 = vst [vmem:[%s1223_s29 + $0x30] sm:$0xff] %v192_v6  ;;  %195 = vst [vmem:[%s1223_s29 + $0x38] sm:$0xff] %v194_v7  ;;  %v198_v9 = vld [vmem:[%s1215_s28 + $0x88] sm:$0xff] }
  0x16   : > { %197 = vst [vmem:[%s1223_s29 + $0x40] sm:$0xff] %v196_v8  ;;  %v200_v10 = vld [vmem:[%s1215_s28 + $0xa0] sm:$0xff]  ;;  %v202_v11 = vld [vmem:[%s1215_s28 + $0xa8] sm:$0xff]  ;;  %199 = vst [vmem:[%s1223_s29 + $0x48] sm:$0xff] %v198_v9 }
  0x17   : > { %201 = vst [vmem:[%s1223_s29 + $0x50] sm:$0xff] %v200_v10  ;;  %203 = vst [vmem:[%s1223_s29 + $0x58] sm:$0xff] %v202_v11  ;;  %v204_v12 = vld [vmem:[%s1215_s28 + $0xc0] sm:$0xff]  ;;  %v206_v13 = vld [vmem:[%s1215_s28 + $0xc8] sm:$0xff] }
  0x18   : > { %v208_v14 = vld [vmem:[%s1215_s28 + $0xe0] sm:$0xff]  ;;  %205 = vst [vmem:[%s1223_s29 + $0x60] sm:$0xff] %v204_v12  ;;  %207 = vst [vmem:[%s1223_s29 + $0x68] sm:$0xff] %v206_v13  ;;  %v210_v15 = vld [vmem:[%s1215_s28 + $0xe8] sm:$0xff] }
  0x19   : > { %209 = vst [vmem:[%s1223_s29 + $0x70] sm:$0xff] %v208_v14  ;;  %v212_v16 = vld [vmem:[%s1215_s28 + $0x100] sm:$0xff]  ;;  %v214_v17 = vld [vmem:[%s1215_s28 + $0x108] sm:$0xff]  ;;  %211 = vst [vmem:[%s1223_s29 + $0x78] sm:$0xff] %v210_v15 }
  0x1a   : > { %213 = vst [vmem:[%s1223_s29 + $0x80] sm:$0xff] %v212_v16  ;;  %215 = vst [vmem:[%s1223_s29 + $0x88] sm:$0xff] %v214_v17  ;;  %v216_v18 = vld [vmem:[%s1215_s28 + $0x120] sm:$0xff]  ;;  %v218_v19 = vld [vmem:[%s1215_s28 + $0x128] sm:$0xff] }
  0x1b   : > { %v220_v20 = vld [vmem:[%s1215_s28 + $0x140] sm:$0xff]  ;;  %217 = vst [vmem:[%s1223_s29 + $0x90] sm:$0xff] %v216_v18  ;;  %219 = vst [vmem:[%s1223_s29 + $0x98] sm:$0xff] %v218_v19  ;;  %v222_v21 = vld [vmem:[%s1215_s28 + $0x148] sm:$0xff] }
  0x1c   : > { %221 = vst [vmem:[%s1223_s29 + $0xa0] sm:$0xff] %v220_v20  ;;  %v224_v22 = vld [vmem:[%s1215_s28 + $0x160] sm:$0xff]  ;;  %v226_v23 = vld [vmem:[%s1215_s28 + $0x168] sm:$0xff]  ;;  %223 = vst [vmem:[%s1223_s29 + $0xa8] sm:$0xff] %v222_v21 }
  0x1d   : > { %225 = vst [vmem:[%s1223_s29 + $0xb0] sm:$0xff] %v224_v22  ;;  %227 = vst [vmem:[%s1223_s29 + $0xb8] sm:$0xff] %v226_v23  ;;  %v228_v24 = vld [vmem:[%s1215_s28 + $0x180] sm:$0xff]  ;;  %v230_v25 = vld [vmem:[%s1215_s28 + $0x188] sm:$0xff] }
  0x1e   : > { %v232_v26 = vld [vmem:[%s1215_s28 + $0x1a0] sm:$0xff]  ;;  %229 = vst [vmem:[%s1223_s29 + $0xc0] sm:$0xff] %v228_v24  ;;  %231 = vst [vmem:[%s1223_s29 + $0xc8] sm:$0xff] %v230_v25  ;;  %v234_v27 = vld [vmem:[%s1215_s28 + $0x1a8] sm:$0xff] }
  0x1f   : > { %233 = vst [vmem:[%s1223_s29 + $0xd0] sm:$0xff] %v232_v26  ;;  %v236_v28 = vld [vmem:[%s1215_s28 + $0x1c0] sm:$0xff]  ;;  %v238_v29 = vld [vmem:[%s1215_s28 + $0x1c8] sm:$0xff]  ;;  %235 = vst [vmem:[%s1223_s29 + $0xd8] sm:$0xff] %v234_v27 }
  0x20   : > { %237 = vst [vmem:[%s1223_s29 + $0xe0] sm:$0xff] %v236_v28  ;;  %239 = vst [vmem:[%s1223_s29 + $0xe8] sm:$0xff] %v238_v29  ;;  %v240_v30 = vld [vmem:[%s1215_s28 + $0x1e0] sm:$0xff]  ;;  %v242_v31 = vld [vmem:[%s1215_s28 + $0x1e8] sm:$0xff] }
  0x21   : > { %v244_v32 = vld [vmem:[%s1215_s28 + $0x200] sm:$0xff]  ;;  %241 = vst [vmem:[%s1223_s29 + $0xf0] sm:$0xff] %v240_v30  ;;  %243 = vst [vmem:[%s1223_s29 + $0xf8] sm:$0xff] %v242_v31  ;;  %v246_v33 = vld [vmem:[%s1215_s28 + $0x208] sm:$0xff] }
  0x22   : > { %245 = vst [vmem:[%s1223_s29 + $0x100] sm:$0xff] %v244_v32  ;;  %v248_v34 = vld [vmem:[%s1215_s28 + $0x220] sm:$0xff]  ;;  %v250_v35 = vld [vmem:[%s1215_s28 + $0x228] sm:$0xff]  ;;  %247 = vst [vmem:[%s1223_s29 + $0x108] sm:$0xff] %v246_v33 }
  0x23   : > { %249 = vst [vmem:[%s1223_s29 + $0x110] sm:$0xff] %v248_v34  ;;  %251 = vst [vmem:[%s1223_s29 + $0x118] sm:$0xff] %v250_v35  ;;  %v252_v36 = vld [vmem:[%s1215_s28 + $0x240] sm:$0xff]  ;;  %v254_v37 = vld [vmem:[%s1215_s28 + $0x248] sm:$0xff] }
  0x24   : > { %v256_v38 = vld [vmem:[%s1215_s28 + $0x260] sm:$0xff]  ;;  %253 = vst [vmem:[%s1223_s29 + $0x120] sm:$0xff] %v252_v36  ;;  %255 = vst [vmem:[%s1223_s29 + $0x128] sm:$0xff] %v254_v37  ;;  %v258_v39 = vld [vmem:[%s1215_s28 + $0x268] sm:$0xff] }
  0x25   : > { %257 = vst [vmem:[%s1223_s29 + $0x130] sm:$0xff] %v256_v38  ;;  %v260_v40 = vld [vmem:[%s1215_s28 + $0x280] sm:$0xff]  ;;  %v262_v41 = vld [vmem:[%s1215_s28 + $0x288] sm:$0xff]  ;;  %259 = vst [vmem:[%s1223_s29 + $0x138] sm:$0xff] %v258_v39 }
  0x26   : > { %261 = vst [vmem:[%s1223_s29 + $0x140] sm:$0xff] %v260_v40  ;;  %263 = vst [vmem:[%s1223_s29 + $0x148] sm:$0xff] %v262_v41  ;;  %v264_v42 = vld [vmem:[%s1215_s28 + $0x2a0] sm:$0xff]  ;;  %v266_v43 = vld [vmem:[%s1215_s28 + $0x2a8] sm:$0xff] }
  0x27   : > { %v268_v44 = vld [vmem:[%s1215_s28 + $0x2c0] sm:$0xff]  ;;  %265 = vst [vmem:[%s1223_s29 + $0x150] sm:$0xff] %v264_v42  ;;  %267 = vst [vmem:[%s1223_s29 + $0x158] sm:$0xff] %v266_v43  ;;  %v270_v45 = vld [vmem:[%s1215_s28 + $0x2c8] sm:$0xff] }
  0x28   : > { %269 = vst [vmem:[%s1223_s29 + $0x160] sm:$0xff] %v268_v44  ;;  %v272_v46 = vld [vmem:[%s1215_s28 + $0x2e0] sm:$0xff]  ;;  %v274_v47 = vld [vmem:[%s1215_s28 + $0x2e8] sm:$0xff]  ;;  %271 = vst [vmem:[%s1223_s29 + $0x168] sm:$0xff] %v270_v45 }
  0x29   : > { %273 = vst [vmem:[%s1223_s29 + $0x170] sm:$0xff] %v272_v46  ;;  %275 = vst [vmem:[%s1223_s29 + $0x178] sm:$0xff] %v274_v47  ;;  %v276_v48 = vld [vmem:[%s1215_s28 + $0x300] sm:$0xff]  ;;  %v278_v49 = vld [vmem:[%s1215_s28 + $0x308] sm:$0xff] }
  0x2a   : > { %v280_v50 = vld [vmem:[%s1215_s28 + $0x320] sm:$0xff]  ;;  %277 = vst [vmem:[%s1223_s29 + $0x180] sm:$0xff] %v276_v48  ;;  %279 = vst [vmem:[%s1223_s29 + $0x188] sm:$0xff] %v278_v49  ;;  %v282_v51 = vld [vmem:[%s1215_s28 + $0x328] sm:$0xff] }
  0x2b   : > { %281 = vst [vmem:[%s1223_s29 + $0x190] sm:$0xff] %v280_v50  ;;  %v284_v52 = vld [vmem:[%s1215_s28 + $0x340] sm:$0xff]  ;;  %v286_v53 = vld [vmem:[%s1215_s28 + $0x348] sm:$0xff]  ;;  %283 = vst [vmem:[%s1223_s29 + $0x198] sm:$0xff] %v282_v51 }
  0x2c   : > { %285 = vst [vmem:[%s1223_s29 + $0x1a0] sm:$0xff] %v284_v52  ;;  %287 = vst [vmem:[%s1223_s29 + $0x1a8] sm:$0xff] %v286_v53  ;;  %v288_v54 = vld [vmem:[%s1215_s28 + $0x360] sm:$0xff]  ;;  %v290_v55 = vld [vmem:[%s1215_s28 + $0x368] sm:$0xff] }
  0x2d   : > { %289 = vst [vmem:[%s1223_s29 + $0x1b0] sm:$0xff] %v288_v54  ;;  %291 = vst [vmem:[%s1223_s29 + $0x1b8] sm:$0xff] %v290_v55 }
  0x2e PF: > { %p946_p5 = scmp.ge.s32.totalorder %s1152_s17, 1  ;;  %p296_p6 = scmp.lt.s32.totalorder %s1152_s17, 3 }
  0x30   : > { %p297_p7 = pnand %p946_p5, %p296_p6 }
  0x31   : > { %s303_s30 = sand.u32 (!%p297_p7), 1, %s1144_s15   ;;  %v1337_v56 = vld [vmem:[%s1423_s0] sm:$0xff] (!%p297_p7)  ;;  %vm695_vm0 = vcmask (!%p297_p7), 785408   ;;  %s947_s9 = sshll.u32 (!%p297_p7), %s1195_s18, 2  ;;  %vm804_vm1 = vcmask (!%p297_p7), 7168  }
  0x32   : > { %300 = sbr.rel (%p297_p7) target bundleno = 477 (0x1dd), region = 47  ;;  %v952_v57 = vcombine.high (!%p297_p7), %v1337_v56, %v1337_v56  ;;  %v951_v50 = vcombine.low (!%p297_p7), %v1337_v56, %v1337_v56  ;;  %p338_p8 = scmp.lt.s32.totalorder (!%p297_p7), %s947_s9, 7 }
  0x33   : > { %s1019_s7 = smul.u32 (!%p297_p7), 448, %s303_s30  ;;  %p343_p9 = scmp.lt.s32.totalorder (!%p297_p7), %s1195_s18, 1 }
  0x34   : > { %1009 = vmatprep.mubr.msk.bf16.mxu0 (!%p297_p7), %vm695_vm0, %v952_v57  ;;  %1010 = vmatprep.mubr.msk.bf16.mxu1 (!%p297_p7), %vm695_vm0, %v952_v57 }
  0x35   : > { %s1341_s8 = scalar_lea.vmem (!%p297_p7), [#allocation2], %s1019_s7 }
  0x36   : > { %v1044_v58 = vld [vmem:[%s1341_s8 + $0x4] ss:$16 sps:$4 sm:$0xff] (!%p297_p7)   ;;  %v1046_v59 = vld [vmem:[%s1341_s8 + $0xc] ss:$16 sps:$4 sm:$0xff] (!%p297_p7)   ;;  %v1048_v60 = vld [vmem:[%s1341_s8] ss:$16 sps:$4 sm:$0xff] (!%p297_p7)  }
  0x37   : > { %699 = vmatprep.subr.bf16.mxu0 (!%p297_p7), %v1044_v58  ;;  %v1049_v61 = vld [vmem:[%s1341_s8 + $0x8] ss:$16 sps:$4 sm:$0xff] (!%p297_p7)   ;;  %740 = vmatprep.subr.bf16.mxu1 (!%p297_p7), %v1046_v59  ;;  %v1050_v62 = vld [vmem:[%s1341_s8 + $0x24] ss:$16 sps:$4 sm:$0xff] (!%p297_p7)   ;;  %v1052_v63 = vld [vmem:[%s1341_s8 + $0x2c] ss:$16 sps:$4 sm:$0xff] (!%p297_p7)  }
  0x38   : > { %700 = vmatpush1.bf16.msra.mxu0 (!%p297_p7), %v1048_v60  ;;  %741 = vmatpush1.bf16.msra.mxu1 (!%p297_p7), %v1049_v61  ;;  %v1054_v0 = vld [vmem:[%s1341_s8 + $0x20] ss:$16 sps:$4 sm:$0xff] (!%p297_p7)   ;;  %v1055_v1 = vld [vmem:[%s1341_s8 + $0x28] ss:$16 sps:$4 sm:$0xff] (!%p297_p7)   ;;  %v1056_v2 = vld [vmem:[%s1341_s8 + $0x44] ss:$16 sps:$4 sm:$0xff] (!%p297_p7)  }
  0x39   : > { %701 = vmatprep.subr.bf16.mxu0 %v1050_v62  ;;  %742 = vmatprep.subr.bf16.mxu1 %v1052_v63  ;;  %v1058_v3 = vld [vmem:[%s1341_s8 + $0x4c] ss:$16 sps:$4 sm:$0xff]   ;;  %v1060_v4 = vld [vmem:[%s1341_s8 + $0x40] ss:$16 sps:$4 sm:$0xff]   ;;  %v1061_v5 = vld [vmem:[%s1341_s8 + $0x48] ss:$16 sps:$4 sm:$0xff]  }
  0x3a   : > { %v1062_v6 = vld [vmem:[%s1341_s8 + $0x64] ss:$16 sps:$4 sm:$0xff]   ;;  %v1064_v7 = vld [vmem:[%s1341_s8 + $0x6c] ss:$16 sps:$4 sm:$0xff]   ;;  %v1066_v8 = vld [vmem:[%s1341_s8 + $0x60] ss:$16 sps:$4 sm:$0xff]  }
  0x3b   : > { %v1067_v9 = vld [vmem:[%s1341_s8 + $0x68] ss:$16 sps:$4 sm:$0xff]   ;;  %v1068_v10 = vld [vmem:[%s1341_s8 + $0x84] ss:$16 sps:$4 sm:$0xff]   ;;  %v1070_v11 = vld [vmem:[%s1341_s8 + $0x8c] ss:$16 sps:$4 sm:$0xff]  }
  0x3c   : > { %702 = vmatpush1.bf16.msra.mxu0 %v1054_v0  ;;  %743 = vmatpush1.bf16.msra.mxu1 %v1055_v1  ;;  %v1072_v12 = vld [vmem:[%s1341_s8 + $0x80] ss:$16 sps:$4 sm:$0xff]   ;;  %v1073_v13 = vld [vmem:[%s1341_s8 + $0x88] ss:$16 sps:$4 sm:$0xff]   ;;  %v1074_v14 = vld [vmem:[%s1341_s8 + $0xa4] ss:$16 sps:$4 sm:$0xff]  }
  0x3d   : > { %703 = vmatprep.subr.bf16.mxu0 %v1056_v2  ;;  %744 = vmatprep.subr.bf16.mxu1 %v1058_v3  ;;  %v1076_v15 = vld [vmem:[%s1341_s8 + $0xac] ss:$16 sps:$4 sm:$0xff]   ;;  %v1078_v16 = vld [vmem:[%s1341_s8 + $0xa0] ss:$16 sps:$4 sm:$0xff]   ;;  %v1079_v17 = vld [vmem:[%s1341_s8 + $0xa8] ss:$16 sps:$4 sm:$0xff]  }
  0x3e   : > { %v1080_v18 = vld [vmem:[%s1341_s8 + $0xc4] ss:$16 sps:$4 sm:$0xff]   ;;  %v1082_v19 = vld [vmem:[%s1341_s8 + $0xcc] ss:$16 sps:$4 sm:$0xff]   ;;  %v1084_v20 = vld [vmem:[%s1341_s8 + $0xc0] ss:$16 sps:$4 sm:$0xff]  }
  0x3f   : > { %v1085_v21 = vld [vmem:[%s1341_s8 + $0xc8] ss:$16 sps:$4 sm:$0xff]   ;;  %v1086_v22 = vld [vmem:[%s1341_s8 + $0xe4] ss:$16 sps:$4 sm:$0xff]   ;;  %v1088_v23 = vld [vmem:[%s1341_s8 + $0xec] ss:$16 sps:$4 sm:$0xff]  }
  0x40   : > { %704 = vmatpush1.bf16.msra.mxu0 %v1060_v4  ;;  %745 = vmatpush1.bf16.msra.mxu1 %v1061_v5  ;;  %v1090_v24 = vld [vmem:[%s1341_s8 + $0xe0] ss:$16 sps:$4 sm:$0xff]   ;;  %v1091_v25 = vld [vmem:[%s1341_s8 + $0xe8] ss:$16 sps:$4 sm:$0xff]   ;;  %v1092_v26 = vld [vmem:[%s1341_s8 + $0x104] ss:$16 sps:$4 sm:$0xff]  }
  0x41   : > { %705 = vmatprep.subr.bf16.mxu0 %v1062_v6  ;;  %746 = vmatprep.subr.bf16.mxu1 %v1064_v7  ;;  %v1094_v27 = vld [vmem:[%s1341_s8 + $0x10c] ss:$16 sps:$4 sm:$0xff]   ;;  %v1096_v28 = vld [vmem:[%s1341_s8 + $0x100] ss:$16 sps:$4 sm:$0xff]   ;;  %v1097_v29 = vld [vmem:[%s1341_s8 + $0x108] ss:$16 sps:$4 sm:$0xff]  }
  0x42   : > { %v1098_v30 = vld [vmem:[%s1341_s8 + $0x124] ss:$16 sps:$4 sm:$0xff]   ;;  %v1100_v31 = vld [vmem:[%s1341_s8 + $0x12c] ss:$16 sps:$4 sm:$0xff]   ;;  %v1102_v32 = vld [vmem:[%s1341_s8 + $0x120] ss:$16 sps:$4 sm:$0xff]  }
  0x43   : > { %v1103_v33 = vld [vmem:[%s1341_s8 + $0x128] ss:$16 sps:$4 sm:$0xff]   ;;  %v1104_v34 = vld [vmem:[%s1341_s8 + $0x144] ss:$16 sps:$4 sm:$0xff]   ;;  %v1106_v35 = vld [vmem:[%s1341_s8 + $0x14c] ss:$16 sps:$4 sm:$0xff]  }
  0x44   : > { %706 = vmatpush1.bf16.msra.mxu0 %v1066_v8  ;;  %747 = vmatpush1.bf16.msra.mxu1 %v1067_v9  ;;  %v1108_v36 = vld [vmem:[%s1341_s8 + $0x140] ss:$16 sps:$4 sm:$0xff]   ;;  %v1109_v37 = vld [vmem:[%s1341_s8 + $0x148] ss:$16 sps:$4 sm:$0xff]   ;;  %v1110_v38 = vld [vmem:[%s1341_s8 + $0x164] ss:$16 sps:$4 sm:$0xff]  }
  0x45   : > { %707 = vmatprep.subr.bf16.mxu0 %v1068_v10  ;;  %748 = vmatprep.subr.bf16.mxu1 %v1070_v11  ;;  %v1112_v39 = vld [vmem:[%s1341_s8 + $0x16c] ss:$16 sps:$4 sm:$0xff]   ;;  %v1114_v40 = vld [vmem:[%s1341_s8 + $0x160] ss:$16 sps:$4 sm:$0xff]   ;;  %v1115_v41 = vld [vmem:[%s1341_s8 + $0x168] ss:$16 sps:$4 sm:$0xff]  }
  0x46   : > { %v1116_v42 = vld [vmem:[%s1341_s8 + $0x184] ss:$16 sps:$4 sm:$0xff]   ;;  %v1118_v43 = vld [vmem:[%s1341_s8 + $0x18c] ss:$16 sps:$4 sm:$0xff]   ;;  %v1120_v44 = vld [vmem:[%s1341_s8 + $0x180] ss:$16 sps:$4 sm:$0xff]  }
  0x47   : > { %v1121_v45 = vld [vmem:[%s1341_s8 + $0x188] ss:$16 sps:$4 sm:$0xff]   ;;  %v1122_v46 = vld [vmem:[%s1341_s8 + $0x1a4] ss:$16 sps:$4 sm:$0xff]   ;;  %v1124_v47 = vld [vmem:[%s1341_s8 + $0x1ac] ss:$16 sps:$4 sm:$0xff]  }
  0x48   : > { %708 = vmatpush1.bf16.msra.mxu0 %v1072_v12  ;;  %749 = vmatpush1.bf16.msra.mxu1 %v1073_v13  ;;  %v1126_v48 = vld [vmem:[%s1341_s8 + $0x1a0] ss:$16 sps:$4 sm:$0xff]   ;;  %v1127_v49 = vld [vmem:[%s1341_s8 + $0x1a8] ss:$16 sps:$4 sm:$0xff]   ;;  %s1432_s9 = smov (!%p338_p8, %s947_s9), 7  ;;  %s1434_s18 = smov (!%p343_p9, %s1195_s18), 1 }
  0x49   : > { %709 = vmatprep.subr.bf16.mxu0 %v1074_v14  ;;  %750 = vmatprep.subr.bf16.mxu1 %v1076_v15  ;;  %s948_s10 = sshll.u32 %s1432_s9, 2  ;;  %s949_s14 = sshll.u32 %s1434_s18, 3 }
  0x4a   : > { %s341_s13 = scalar_lea.vmem %s1425_s2, %s948_s10  ;;  %s346_s20 = scalar_lea.vmem %s1426_s3, %s949_s14 }
  0x4b   : > { %s350_s24 = scalar_lea.vmem %s1427_s4, %s949_s14 }
  0x4c   : > { %710 = vmatpush1.bf16.msra.mxu0 %v1078_v16  ;;  %751 = vmatpush1.bf16.msra.mxu1 %v1079_v17 }
  0x4d   : > { %711 = vmatprep.subr.bf16.mxu0 %v1080_v18  ;;  %752 = vmatprep.subr.bf16.mxu1 %v1082_v19 }
  0x50   : > { %712 = vmatpush1.bf16.msra.mxu0 %v1084_v20  ;;  %753 = vmatpush1.bf16.msra.mxu1 %v1085_v21 }
  0x51   : > { %713 = vmatprep.subr.bf16.mxu0 %v1086_v22  ;;  %754 = vmatprep.subr.bf16.mxu1 %v1088_v23 }
  0x54   : > { %714 = vmatpush1.bf16.msra.mxu0 %v1090_v24  ;;  %755 = vmatpush1.bf16.msra.mxu1 %v1091_v25 }
  0x55   : > { %715 = vmatprep.subr.bf16.mxu0 %v1092_v26  ;;  %756 = vmatprep.subr.bf16.mxu1 %v1094_v27 }
  0x58   : > { %716 = vmatpush1.bf16.msra.mxu0 %v1096_v28  ;;  %757 = vmatpush1.bf16.msra.mxu1 %v1097_v29 }
  0x59   : > { %717 = vmatprep.subr.bf16.mxu0 %v1098_v30  ;;  %758 = vmatprep.subr.bf16.mxu1 %v1100_v31 }
  0x5c   : > { %718 = vmatpush1.bf16.msra.mxu0 %v1102_v32  ;;  %759 = vmatpush1.bf16.msra.mxu1 %v1103_v33 }
  0x5d   : > { %719 = vmatprep.subr.bf16.mxu0 %v1104_v34  ;;  %760 = vmatprep.subr.bf16.mxu1 %v1106_v35 }
  0x60   : > { %720 = vmatpush1.bf16.msra.mxu0 %v1108_v36  ;;  %761 = vmatpush1.bf16.msra.mxu1 %v1109_v37 }
  0x61   : > { %721 = vmatprep.subr.bf16.mxu0 %v1110_v38  ;;  %762 = vmatprep.subr.bf16.mxu1 %v1112_v39 }
  0x64   : > { %722 = vmatpush1.bf16.msra.mxu0 %v1114_v40  ;;  %763 = vmatpush1.bf16.msra.mxu1 %v1115_v41 }
  0x65   : > { %723 = vmatprep.subr.bf16.mxu0 %v1116_v42  ;;  %764 = vmatprep.subr.bf16.mxu1 %v1118_v43 }
  0x68   : > { %724 = vmatpush1.bf16.msra.mxu0 %v1120_v44  ;;  %765 = vmatpush1.bf16.msra.mxu1 %v1121_v45 }
  0x69   : > { %725 = vmatprep.subr.bf16.mxu0 %v1122_v46  ;;  %766 = vmatprep.subr.bf16.mxu1 %v1124_v47 }
  0x6c   : > { %726 = vmatpush1.bf16.msra.mxu0 %v1126_v48  ;;  %767 = vmatpush1.bf16.msra.mxu1 %v1127_v49 }
  0x6f   : > { %732 = vmatmul.mubr.bf16.vlgmr.msra.gmra.mrb[0].mxu0 %v951_v50  ;;  %773 = vmatmul.mubr.bf16.vlgmr.msra.gmra.mrb[0].mxu1 %v951_v50 }
 0x142   : > { %v733_v51 = vpop.f32.mrb[0].mxu0  ;;  %v774_v52 = vpop.f32.mrb[0].mxu1 }
 0x143   : > { %v806_v53 = vmul.f32 %v733_v51, %v733_v51  ;;  %v808_v54 = vmul.f32 %v774_v52, %v774_v52  ;;  %v735_v55 = vpop.f32.mrb[1].mxu0  ;;  %v776_v57 = vpop.f32.mrb[1].mxu1 }
 0x144   : > { %v1016_v58 = vpack.c.bf16 %v735_v55, %v733_v51  ;;  %v799_v56 = vadd.f32 %v735_v55, %v733_v51  ;;  %v807_v59 = vmul.f32 %v735_v55, %v735_v55  ;;  %v1017_v60 = vpack.c.bf16 %v776_v57, %v774_v52  ;;  %v737_v61 = vpop.f32.mrb[2].mxu0  ;;  %v778_v62 = vpop.f32.mrb[2].mxu1 }
 0x145   : > { %v738_v63 = vpop.f32.mrb[3].mxu0  ;;  %v779_v0 = vpop.f32.mrb[3].mxu1  ;;  %v809_v4 = vmul.f32 %v776_v57, %v776_v57 }
 0x146   : > { %797 = vst [vmem:[%s341_s13] sm:$0xff] %v1016_v58  ;;  %v800_v1 = vadd.f32 %v799_v56, %v774_v52  ;;  %v810_v2 = vadd.f32 %v807_v59, %v806_v53  ;;  %798 = vst [vmem:[%s341_s13 + $0x8] sm:$0xff] %v1017_v60 }
 0x148   : > { %v801_v3 = vadd.f32 %v800_v1, %v776_v57  ;;  %v811_v5 = vadd.f32 %v810_v2, %v808_v54 }
 0x14a   : > { %802 = vadd.xlane.f32.xlu0 %v801_v3  ;;  %v812_v6 = vadd.f32 %v811_v5, %v809_v4 }
 0x14e   : > { %813 = vadd.xlane.f32.xlu0 %v812_v6 }
 0x1d7   : > { %v803_v7 = vpop.xlane.xlu0 %802 }
 0x1d8   : > { %805 = vst.msk [vmem:[%s346_s20] sm:$0xff] %vm804_vm1, %v803_v7 }
 0x1db   : > { %v814_v8 = vpop.xlane.xlu0 %813 }
 0x1dc   : > { %815 = vst.msk [vmem:[%s350_s24] sm:$0xff] %vm804_vm1, %v814_v8 }
 0x1dd PF: > { %p12_p10 = scmp.ge.s32.totalorder %s1198_s19, 4   ;;  %s1428_s15 = smov %s1148_s16 }
 0x1de   : > { %s1429_s16 = smov %s1207_s22  ;;  %s1430_s17 = smov %s1198_s19 }
 0x1df   :  { %14 = sbr.rel (!%p12_p10) target bundleno = 2 (0x2), region = 110 }

// kernel: resbasicblock_forward.7
= control target key start
LH: loop header
LB: loop body
LE: loop exit
PB: predicated region body
PF: predicated region fallthrough
CT: control target
= control target key end

     0   :  { %s477_s21 = smov 0   ;;  %s513_s0 = inlined_call_operand.vmem [shape: bf16[8,1024], index: 0, kind: input, shape index: {}]   ;;  %s514_s1 = inlined_call_operand.vmem [shape: bf16[8,1024], index: 1, kind: input, shape index: {}]   ;;  %s515_s2 = inlined_call_operand.vmem [shape: f32[8,1], index: 2, kind: input, shape index: {}]   ;;  %s516_s3 = inlined_call_operand.vmem [shape: f32[8,1], index: 3, kind: input, shape index: {}]   ;;  %s517_s4 = inlined_call_operand.vmem [shape: f32[8,1], index: 4, kind: input, shape index: {}]   ;;  %s518_s5 = inlined_call_operand.vmem [shape: f32[8,1], index: 5, kind: input, shape index: {}]   ;;  %s519_s6 = inlined_call_operand.vmem [shape: f32[8,1024], index: 6, kind: output, shape index: {}]  }
   0x1 LB: > { %s409_s22 = sadd.s32 4294967295, %s439_s21   ;;  %p413_p0 = scmp.ge.s32.totalorder %s439_s21, 1  ;;  %s439_s21 = sphi %s477_s21, %s16_s21  }
   0x2   : > { %p224_p1 = scmp.lt.s32.totalorder %s439_s21, 3 }
   0x4   : > { %p225_p2 = pnand %p413_p0, %p224_p1 }
   0x5   : > { %v299_v0 = vld [vmem:[%s516_s3] sm:$0xff] (!%p225_p2)  ;;  %v441_v2 = vmov (!%p225_p2), 0   ;;  %s414_s7 = sshll.u32 (!%p225_p2), %s409_s22, 2 }
   0x6   : > { %228 = sbr.rel (%p225_p2) target bundleno = 149 (0x95), region = 44  ;;  %v289_v1 = vld [vmem:[%s515_s2] sm:$0xff] (!%p225_p2)  ;;  %432 = vset.pattern.permute.xlu1 (!%p225_p2), %v441_v2  ;;  %431 = vset.pattern.permute.xlu0 (!%p225_p2), %v441_v2  ;;  %p260_p3 = scmp.lt.s32.totalorder (!%p225_p2), %s414_s7, 7 }
   0x7   : > { %302 = vperm.xlu1 (!%p225_p2), %432, %v299_v0   ;;  %292 = vperm.xlu0 (!%p225_p2), %431, %v289_v1   ;;  %v319_v3 = vld [vmem:[%s518_s5] sm:$0xff] (!%p225_p2) }
   0x8   : > { %v309_v4 = vld [vmem:[%s517_s4] sm:$0xff] (!%p225_p2) }
   0xb   : > { %322 = vperm.xlu1 (!%p225_p2), %432, %v319_v3   ;;  %312 = vperm.xlu0 (!%p225_p2), %431, %v309_v4  }
   0xd   : > { %s521_s7 = smov (!%p260_p3, %s414_s7), 7 }
   0xe   : > { %s415_s8 = sshll.u32 %s521_s7, 2  ;;  %s419_s15 = sshll.u32 %s521_s7, 3 }
   0xf   : > { %s263_s11 = scalar_lea.vmem %s513_s0, %s415_s8  ;;  %s269_s14 = scalar_lea.vmem %s514_s1, %s415_s8 }
  0x10   : > { %v277_v5 = vld [vmem:[%s263_s11] sm:$0xff]  ;;  %v278_v6 = vld [vmem:[%s263_s11 + $0x8] sm:$0xff]  ;;  %s275_s18 = scalar_lea.vmem %s519_s6, %s419_s15 }
  0x11   : > { %v279_v7 = vunpack.c.l.bf16 %v277_v5  ;;  %v280_v8 = vunpack.c.h.bf16 %v277_v5  ;;  %v281_v9 = vunpack.c.l.bf16 %v278_v6  ;;  %v283_v10 = vld [vmem:[%s269_s14] sm:$0xff]  ;;  %v284_v11 = vld [vmem:[%s269_s14 + $0x8] sm:$0xff]  ;;  %v282_v14 = vunpack.c.h.bf16 %v278_v6 }
  0x12   : > { %v285_v15 = vunpack.c.l.bf16 %v283_v10  ;;  %v286_v16 = vunpack.c.h.bf16 %v283_v10  ;;  %v287_v17 = vunpack.c.l.bf16 %v284_v11  ;;  %v288_v18 = vunpack.c.h.bf16 %v284_v11 }
  0x86   : > { %v303_v12 = vpop.permute.xlu1 %302  ;;  %v293_v13 = vpop.permute.xlu0 %292 }
  0x87   : > { %v295_v19 = vmul.f32 %v293_v13, %v279_v7  ;;  %v296_v20 = vmul.f32 %v293_v13, %v280_v8  ;;  %v297_v21 = vmul.f32 %v293_v13, %v281_v9  ;;  %v298_v22 = vmul.f32 %v293_v13, %v282_v14 }
  0x89   : > { %v305_v28 = vadd.f32 %v303_v12, %v295_v19  ;;  %v306_v29 = vadd.f32 %v303_v12, %v296_v20  ;;  %v307_v30 = vadd.f32 %v303_v12, %v297_v21  ;;  %v308_v36 = vadd.f32 %v303_v12, %v298_v22 }
  0x8a   : > { %v313_v23 = vpop.permute.xlu0 %312  ;;  %v323_v31 = vpop.permute.xlu1 %322 }
  0x8b   : > { %v315_v24 = vmul.f32 %v313_v23, %v285_v15  ;;  %v316_v25 = vmul.f32 %v313_v23, %v286_v16  ;;  %v317_v26 = vmul.f32 %v313_v23, %v287_v17  ;;  %v318_v27 = vmul.f32 %v313_v23, %v288_v18 }
  0x8d   : > { %v325_v32 = vadd.f32 %v323_v31, %v315_v24  ;;  %v326_v33 = vadd.f32 %v323_v31, %v316_v25  ;;  %v327_v34 = vadd.f32 %v323_v31, %v317_v26  ;;  %v328_v35 = vadd.f32 %v323_v31, %v318_v27 }
  0x8f   : > { %v329_v37 = vadd.f32 %v325_v32, %v305_v28  ;;  %v330_v38 = vadd.f32 %v326_v33, %v306_v29  ;;  %v331_v39 = vadd.f32 %v327_v34, %v307_v30  ;;  %v332_v40 = vadd.f32 %v328_v35, %v308_v36 }
  0x91   : > { %v333_v41 = vmax.f32 %v329_v37, 0.0  ;;  %v334_v42 = vmax.f32 %v330_v38, 0.0  ;;  %v335_v43 = vmax.f32 %v331_v39, 0.0  ;;  %v336_v44 = vmax.f32 %v332_v40, 0.0 }
  0x93   : > { %337 = vst [vmem:[%s275_s18] sm:$0xff] %v333_v41  ;;  %338 = vst [vmem:[%s275_s18 + $0x8] sm:$0xff] %v334_v42 }
  0x94   : > { %339 = vst [vmem:[%s275_s18 + $0x10] sm:$0xff] %v335_v43  ;;  %340 = vst [vmem:[%s275_s18 + $0x18] sm:$0xff] %v336_v44 }
  0x95 PF: > { %s16_s21 = sadd.s32 1, %s439_s21  }
  0x96   : > { %p13_p4 = scmp.ge.s32.totalorder %s16_s21, 4  }
  0x98   :  { %15 = sbr.rel (!%p13_p4) target bundleno = 1 (0x1), region = 77 }

</bundles_post_ra>
